<compile_context>
chip_gen: v6e
topology: v6e:2x2x1
jax: 0.10.0
libtpu: 0.0.40
codegen_flags: <defaults>
</compile_context>

<pallas_src>
import functools

import jax
import jax.numpy as jnp
from jax import lax
from jax.experimental import pallas as pl
from jax.experimental.pallas import tpu as pltpu


PACK_WIDTH = 128   # lane-dense packed projection width: q | k | v | beta | pad
OUT_WIDTH = 128    # lane-dense (padded) output width of kernel 2


# ----------------------------------------------------------------------------
# Kernel 1 (grid=(1,)): fused q/k/v/beta projection for all B*T rows at once,
# causal depthwise conv via in-vreg sublane rolls + causal mask, SiLU/sigmoid,
# in-kernel bf16 rounding, per-head q/k L2-norm via one block-diag MXU matmul.
# ----------------------------------------------------------------------------
def _proj_conv_act_kernel(x_ref, w_ref, cw_ref, blk_ref, o_ref, *,
                          T, K, kd, vd, scale):
    BT, P = o_ref.shape
    qk_end = 2 * kd            # cols [0, qk_end)        -> q | k
    qkv_end = 2 * kd + vd      # cols [qk_end, qkv_end)  -> v ; rest -> beta | pad

    # one lane-dense matmul for q/k/v/beta, all B*T rows (batch folded into rows)
    y = jnp.dot(x_ref[...], w_ref[...], preferred_element_type=jnp.float32)   # (BT, P)

    # causal depthwise conv: tap s reads y[row - s]; built with sublane rolls on
    # the XLU plus an iota mask that is causal AND blanks cross-batch wrap rows.
    cw = cw_ref[...]                                               # (K, P)
    tpos = lax.broadcasted_iota(jnp.int32, (BT, P), 0) % T         # pos within sequence
    acc = y * cw[K - 1:K, :]
    for s in range(1, K):                                          # static taps
        tap = jnp.where(tpos >= s, pltpu.roll(y, s, axis=0), 0.0)
        acc = acc + tap * cw[K - 1 - s:K - s, :]

    col = lax.broadcasted_iota(jnp.int32, (BT, P), 1)
    sig = jax.nn.sigmoid(acc)
    act = jnp.where(col < qkv_end, acc * sig, sig)       # SiLU for q/k/v, sigmoid for beta
    # reference hands bf16 q/k/v to the recurrence -> round in-kernel (beta stays f32)
    act = jnp.where(col < qkv_end,
                    act.astype(jnp.bfloat16).astype(jnp.float32), act)

    # per-head sum-of-squares for q/k via block-diag matmul (constant 0/1 mask operand)
    ss = jnp.dot(act * act, blk_ref[...], preferred_element_type=jnp.float32)  # (BT, P)
    inv = pl.reciprocal(jnp.sqrt(ss) + 1e-6, approx=True)           # EUP slot
    norm = jnp.where(col < qk_end, inv, 1.0) * jnp.where(col < kd, scale, 1.0)
    o_ref[...] = act * norm


# ----------------------------------------------------------------------------
# Kernel 2 (grid=(1,)): lane-packed delta-rule recurrence + RMSNorm + out-proj.
# State S: (Dk, B*H*Dv); lane = (b*H + h)*Dv + j (all recurrences at once).
# ----------------------------------------------------------------------------
def _delta_recur_kernel(q_ref, k_ref, v_ref, b_ref, rep_ref, blk_ref,
                        wrms_ref, wo_ref, o_ref, *, T, Dk, Dv, eps):
    L = rep_ref.shape[1]                  # B*H*Dv packed lanes

    # Expand q/k/beta over the Dv lanes once, in-kernel, with the otherwise idle
    # MXU and a constant 0/1 replication matrix (off the serial recurrence chain).
    rep = rep_ref[...]
    qf = jnp.dot(q_ref[...], rep, preferred_element_type=jnp.float32)   # (T*Dk, L)
    kf = jnp.dot(k_ref[...], rep, preferred_element_type=jnp.float32)   # (T*Dk, L)
    bf = jnp.dot(b_ref[...], rep, preferred_element_type=jnp.float32)   # (T, L)
    vf = v_ref[...]                                                      # (T, L)

    # delta-rule recurrence: per-step serial chain is VPU broadcast-multiply plus
    # one sublane reduction; everything register-carried, statically unrolled.
    S = jnp.zeros((Dk, L), jnp.float32)
    outs = []
    for t in range(T):
        kb = kf[t * Dk:(t + 1) * Dk, :]                  # (Dk, L), sublane-tile aligned
        qb = qf[t * Dk:(t + 1) * Dk, :]
        vt = vf[t:t + 1, :]                              # (1, L)
        bt = bf[t:t + 1, :]                              # (1, L)
        kS = jnp.sum(kb * S, axis=0, keepdims=True)      # (1, L)
        v_new = (vt - kS) * bt
        S = S + kb * v_new                               # rank-1 update (VPU broadcast)
        outs.append(jnp.sum(qb * S, axis=0, keepdims=True))
    o = jnp.concatenate(outs, axis=0)                    # (T, L), register-carried

    # reference rounds the recurrence output to bf16, then f32 RMSNorm + out-proj
    o = o.astype(jnp.bfloat16).astype(jnp.float32)
    ss = jnp.dot(o * o, blk_ref[...], preferred_element_type=jnp.float32)  # per-head Dv sums
    o = o * lax.rsqrt(ss * (1.0 / Dv) + eps) * wrms_ref[...]
    # fused per-batch output projection, zero-padded to 128 lanes -> dense store
    o_ref[...] = jnp.dot(o, wo_ref[...], preferred_element_type=jnp.float32)


# ----------------------------------------------------------------------------
# Parameter init (PyTorch module layout: Linear weights stored (in, out))
# ----------------------------------------------------------------------------
def init_params(key, d_model=32, num_heads=4, conv_size=4):
    key_dim = d_model      # expand_k = 1.0
    value_dim = d_model    # expand_v = 1.0
    ks = jax.random.split(key, 8)

    def lin(k, fan_in, fan_out):
        bound = 1.0 / (fan_in ** 0.5)
        return jax.random.uniform(k, (fan_in, fan_out), jnp.float32, -bound, bound)

    cb = 1.0 / (conv_size ** 0.5)
    return dict(
        q_proj=lin(ks[0], d_model, key_dim),
        k_proj=lin(ks[1], d_model, key_dim),
        v_proj=lin(ks[2], d_model, value_dim),
        b_proj=lin(ks[3], d_model, num_heads),
        q_conv_w=jax.random.uniform(ks[4], (conv_size, key_dim), jnp.float32, -cb, cb),
        k_conv_w=jax.random.uniform(ks[5], (conv_size, key_dim), jnp.float32, -cb, cb),
        v_conv_w=jax.random.uniform(ks[6], (conv_size, value_dim), jnp.float32, -cb, cb),
        o_norm_w=jnp.ones((value_dim // num_heads,), jnp.float32),
        o_proj=lin(ks[7], value_dim, d_model),
    )


# ----------------------------------------------------------------------------
# Forward: 2 pallas_calls + minimal XLA layout glue.
# ----------------------------------------------------------------------------
def delta_net_forward(params, x, *, num_heads=4, eps=1e-5):
    B, T, D = x.shape
    H = num_heads
    kd = params["q_proj"].shape[1]
    vd = params["v_proj"].shape[1]
    Dm = params["o_proj"].shape[1]
    Dk, Dv = kd // H, vd // H
    K = params["q_conv_w"].shape[0]
    P = PACK_WIDTH
    N = B * H
    L = N * Dv               # == B * vd : packed recurrence lanes
    assert 2 * kd + vd + H <= P and L <= 128 and B * Dm <= OUT_WIDTH

    # -- packed weights (param-only layout ops; tiny) ----------------------------
    w_cat = jnp.concatenate(
        [params["q_proj"], params["k_proj"], params["v_proj"], params["b_proj"]], axis=1)
    w_pack = jnp.pad(w_cat, ((0, 0), (0, P - w_cat.shape[1])))
    conv_cat = jnp.concatenate(
        [params["q_conv_w"], params["k_conv_w"], params["v_conv_w"]], axis=1)
    ident_tap = jnp.zeros((K, P - conv_cat.shape[1]), jnp.float32).at[K - 1, :].set(1.0)
    conv_pack = jnp.concatenate([conv_cat, ident_tap], axis=1)   # beta/pad: identity tap

    # -- constant 0/1 masks & replication matrices (constant-folded under jit) ---
    cP = jnp.arange(P)
    blk_qk = (((cP[:, None] // Dk) == (cP[None, :] // Dk)) &
              (cP[None, :] < 2 * kd)).astype(jnp.float32)                      # (P, P)
    cL = jnp.arange(L)
    rep = ((cL[None, :] // Dv) == jnp.arange(N)[:, None]).astype(jnp.float32)  # (N, L)
    blk_rms = ((cL[:, None] // Dv) == (cL[None, :] // Dv)).astype(jnp.float32) # (L, L)
    w_rms = jnp.tile(params["o_norm_w"], N).reshape(1, L)
    wo2 = jnp.kron(jnp.eye(B, dtype=jnp.float32), params["o_proj"])            # (B*vd, B*Dm)
    wo2 = jnp.pad(wo2, ((0, 0), (0, OUT_WIDTH - B * Dm)))                      # lane-dense

    # -- kernel 1: fused projections + conv + activations + q/k norm -------------
    k1 = functools.partial(_proj_conv_act_kernel, T=T, K=K, kd=kd, vd=vd,
                           scale=Dk ** -0.5)
    y = pl.pallas_call(
        k1,
        out_shape=jax.ShapeDtypeStruct((B * T, P), jnp.float32),
        grid=(1,),
        in_specs=[
            pl.BlockSpec((B * T, D), lambda i: (0, 0)),
            pl.BlockSpec((D, P), lambda i: (0, 0)),
            pl.BlockSpec((K, P), lambda i: (0, 0)),
            pl.BlockSpec((P, P), lambda i: (0, 0)),
        ],
        out_specs=pl.BlockSpec((B * T, P), lambda i: (0, 0)),
        compiler_params=pltpu.CompilerParams(dimension_semantics=("arbitrary",)),
    )(x.reshape(B * T, D), w_pack, conv_pack, blk_qk)

    # -- layout-only glue: 4 small fusions, no Dv-broadcasts ---------------------
    yb = y.reshape(B, T, P)
    q_in = yb[:, :, :kd].reshape(B, T, H, Dk).transpose(1, 3, 0, 2).reshape(T * Dk, N)
    k_in = yb[:, :, kd:2 * kd].reshape(B, T, H, Dk).transpose(1, 3, 0, 2).reshape(T * Dk, N)
    yT = yb.transpose(1, 0, 2)                                  # (T, B, P)
    v_in = yT[:, :, 2 * kd:2 * kd + vd].reshape(T, L)
    b_in = yT[:, :, 2 * kd + vd:2 * kd + vd + H].reshape(T, N)

    # -- kernel 2: recurrence (lanes = B*H*Dv) + RMSNorm + output projection -----
    k2 = functools.partial(_delta_recur_kernel, T=T, Dk=Dk, Dv=Dv, eps=eps)
    out2 = pl.pallas_call(
        k2,
        out_shape=jax.ShapeDtypeStruct((T, OUT_WIDTH), jnp.float32),
        grid=(1,),
        in_specs=[
            pl.BlockSpec((T * Dk, N), lambda i: (0, 0)),
            pl.BlockSpec((T * Dk, N), lambda i: (0, 0)),
            pl.BlockSpec((T, L), lambda i: (0, 0)),
            pl.BlockSpec((T, N), lambda i: (0, 0)),
            pl.BlockSpec((N, L), lambda i: (0, 0)),
            pl.BlockSpec((L, L), lambda i: (0, 0)),
            pl.BlockSpec((1, L), lambda i: (0, 0)),
            pl.BlockSpec((L, OUT_WIDTH), lambda i: (0, 0)),
        ],
        out_specs=pl.BlockSpec((T, OUT_WIDTH), lambda i: (0, 0)),
        compiler_params=pltpu.CompilerParams(dimension_semantics=("arbitrary",)),
    )(q_in, k_in, v_in, b_in, rep, blk_rms, w_rms, wo2)

    return out2[:, :B * Dm].reshape(T, B, Dm).transpose(1, 0, 2)   # (B, T, d_model)


# ----------------------------------------------------------------------------
# Pure-JAX reference (mirrors the PyTorch forward with default flags).
# ----------------------------------------------------------------------------
def delta_net_reference(params, x, *, num_heads=4, eps=1e-5):
    B, T, D = x.shape
    H = num_heads
    q = x @ params["q_proj"]
    k = x @ params["k_proj"]
    v = x @ params["v_proj"]
    beta = jax.nn.sigmoid(x @ params["b_proj"])          # (B, T, H)

    def conv_silu(z, w):
        K = w.shape[0]
        zp = jnp.pad(z, ((0, 0), (K - 1, 0), (0, 0)))
        y = sum(zp[:, i:i + T, :] * w[i] for i in range(K))
        return y * jax.nn.sigmoid(y)

    q = conv_silu(q, params["q_conv_w"])
    k = conv_silu(k, params["k_conv_w"])
    v = conv_silu(v, params["v_conv_w"])
    Dk = q.shape[-1] // H
    Dv = v.shape[-1] // H
    qh = q.reshape(B, T, H, Dk).astype(jnp.bfloat16).astype(jnp.float32)
    kh = k.reshape(B, T, H, Dk).astype(jnp.bfloat16).astype(jnp.float32)
    vh = v.reshape(B, T, H, Dv).astype(jnp.bfloat16).astype(jnp.float32)
    qh = qh / (jnp.sqrt(jnp.sum(qh * qh, -1, keepdims=True)) + 1e-6) * (Dk ** -0.5)
    kh = kh / (jnp.sqrt(jnp.sum(kh * kh, -1, keepdims=True)) + 1e-6)

    S = jnp.zeros((B, H, Dk, Dv), jnp.float32)
    outs = []
    for t in range(T):
        kt, qt, vt = kh[:, t], qh[:, t], vh[:, t]
        bt = beta[:, t][..., None]
        kS = jnp.einsum('bhk,bhkv->bhv', kt, S)
        v_new = (vt - kS) * bt
        S = S + jnp.einsum('bhk,bhv->bhkv', kt, v_new)
        outs.append(jnp.einsum('bhk,bhkv->bhv', qt, S))
    o = jnp.stack(outs, axis=1).astype(jnp.bfloat16).astype(jnp.float32)
    o = o * lax.rsqrt(jnp.mean(o * o, -1, keepdims=True) + eps) * params["o_norm_w"]
    return o.reshape(B, T, H * Dv) @ params["o_proj"]


if __name__ == "__main__":
    key = jax.random.PRNGKey(0)
    pkey, xkey = jax.random.split(key)
    d_model, num_heads, B, T = 32, 4, 2, 8   # seq <= 64 -> fused_recurrent branch
    params = init_params(pkey, d_model=d_model, num_heads=num_heads, conv_size=4)
    x = jax.random.normal(xkey, (B, T, d_model), jnp.float32)

    fwd = jax.jit(functools.partial(delta_net_forward, num_heads=num_heads))
    out = jax.block_until_ready(fwd(params, x))

    with jax.default_matmul_precision("highest"):
        ref = jax.block_until_ready(
            delta_net_reference(params, x, num_heads=num_heads))

    assert out.shape == (B, T, d_model)
    assert jnp.all(jnp.isfinite(out))
    max_err = float(jnp.max(jnp.abs(out - ref)))
    assert max_err < 5e-2, f"mismatch vs pure-JAX reference: max abs err = {max_err}"
    print("KERNEL_OK")
</pallas_src>

<mosaic_0001>
module attributes {stable_mosaic.version = 11 : i64} {
  func.func @_proj_conv_act_kernel(%arg0: i32, %arg1: memref<16x32xf32, #tpu.memory_space<vmem>>, %arg2: memref<32x128xf32, #tpu.memory_space<vmem>>, %arg3: memref<4x128xf32, #tpu.memory_space<vmem>>, %arg4: memref<128x128xf32, #tpu.memory_space<vmem>>, %arg5: memref<16x128xf32, #tpu.memory_space<vmem>>) attributes {dimension_semantics = [#tpu.dimension_semantics<arbitrary>], iteration_bounds = array<i64: 1>, scalar_prefetch = 0 : i64, scratch_operands = 0 : i64, tpu.core_type = #tpu.core_type<tc>, window_params = [{pipeline_mode = #tpu.pipeline_mode<synchronous>, transform_indices = @transform_0, window_bounds = array<i64: 16, 32>}, {pipeline_mode = #tpu.pipeline_mode<synchronous>, transform_indices = @transform_1, window_bounds = array<i64: 32, 128>}, {pipeline_mode = #tpu.pipeline_mode<synchronous>, transform_indices = @transform_2, window_bounds = array<i64: 4, 128>}, {pipeline_mode = #tpu.pipeline_mode<synchronous>, transform_indices = @transform_3, window_bounds = array<i64: 128, 128>}, {pipeline_mode = #tpu.pipeline_mode<synchronous>, transform_indices = @transform_4, window_bounds = array<i64: 16, 128>}]} {
    %c0 = arith.constant 0 : index
    %c0_0 = arith.constant 0 : index
    %0 = vector.load %arg1[%c0, %c0_0] : memref<16x32xf32, #tpu.memory_space<vmem>>, vector<16x32xf32>
    %c0_1 = arith.constant 0 : index
    %c0_2 = arith.constant 0 : index
    %1 = vector.load %arg2[%c0_1, %c0_2] : memref<32x128xf32, #tpu.memory_space<vmem>>, vector<32x128xf32>
    %cst = arith.constant dense<0.000000e+00> : vector<16x128xf32>
    %2 = tpu.matmul %0, %1, %cst {dimension_numbers = #tpu.dot_dimension_numbers<[1], [0], [0], [1], [0, 0, 1, 1], [], []>} : vector<16x32xf32>, vector<32x128xf32>, vector<16x128xf32> -> vector<16x128xf32>
    %c0_3 = arith.constant 0 : index
    %c0_4 = arith.constant 0 : index
    %3 = vector.load %arg3[%c0_3, %c0_4] : memref<4x128xf32, #tpu.memory_space<vmem>>, vector<4x128xf32>
    %4 = tpu.iota {dimensions = array<i32: 0>} : vector<16x128xi32>
    %c8_i32 = arith.constant 8 : i32
    %c0_i32 = arith.constant 0 : i32
    %5 = arith.cmpi eq, %c8_i32, %c0_i32 : i32
    %c1_i32 = arith.constant 1 : i32
    %6 = arith.select %5, %c1_i32, %c8_i32 : i32
    %7 = vector.broadcast %6 : i32 to vector<16x128xi32>
    %8 = arith.remsi %4, %7 : vector<16x128xi32>
    %c0_i32_5 = arith.constant 0 : i32
    %9 = vector.broadcast %c0_i32_5 : i32 to vector<16x128xi32>
    %10 = arith.cmpi ne, %8, %9 : vector<16x128xi32>
    %c0_i32_6 = arith.constant 0 : i32
    %11 = vector.broadcast %c0_i32_6 : i32 to vector<16x128xi32>
    %12 = arith.cmpi slt, %8, %11 : vector<16x128xi32>
    %c0_i32_7 = arith.constant 0 : i32
    %13 = arith.cmpi slt, %6, %c0_i32_7 : i32
    %14 = vector.broadcast %13 : i1 to vector<16x128xi1>
    %15 = vector.broadcast %14 : vector<16x128xi1> to vector<16x128xi1>
    %16 = arith.xori %12, %15 : vector<16x128xi1>
    %17 = arith.andi %16, %10 : vector<16x128xi1>
    %18 = vector.broadcast %6 : i32 to vector<16x128xi32>
    %19 = arith.addi %8, %18 : vector<16x128xi32>
    %20 = arith.select %17, %19, %8 : vector<16x128xi1>, vector<16x128xi32>
    %21 = vector.extract_strided_slice %3 {offsets = [3, 0], sizes = [1, 128], strides = [1, 1]} : vector<4x128xf32> to vector<1x128xf32>
    %22 = vector.broadcast %21 : vector<1x128xf32> to vector<16x128xf32>
    %23 = arith.mulf %2, %22 : vector<16x128xf32>
    %c1_i32_8 = arith.constant 1 : i32
    %24 = vector.broadcast %c1_i32_8 : i32 to vector<16x128xi32>
    %25 = arith.cmpi sge, %20, %24 : vector<16x128xi32>
    %c1_i32_9 = arith.constant 1 : i32
    %26 = tpu.dynamic_rotate %2 by %c1_i32_9 dim 0 : vector<16x128xf32>, i32 -> vector<16x128xf32>
    %cst_10 = arith.constant 0.000000e+00 : f32
    %27 = vector.broadcast %cst_10 : f32 to vector<16x128xf32>
    %28 = arith.select %25, %26, %27 : vector<16x128xi1>, vector<16x128xf32>
    %29 = vector.extract_strided_slice %3 {offsets = [2, 0], sizes = [1, 128], strides = [1, 1]} : vector<4x128xf32> to vector<1x128xf32>
    %30 = vector.broadcast %29 : vector<1x128xf32> to vector<16x128xf32>
    %31 = arith.mulf %28, %30 : vector<16x128xf32>
    %32 = arith.addf %23, %31 : vector<16x128xf32>
    %c2_i32 = arith.constant 2 : i32
    %33 = vector.broadcast %c2_i32 : i32 to vector<16x128xi32>
    %34 = arith.cmpi sge, %20, %33 : vector<16x128xi32>
    %c2_i32_11 = arith.constant 2 : i32
    %35 = tpu.dynamic_rotate %2 by %c2_i32_11 dim 0 : vector<16x128xf32>, i32 -> vector<16x128xf32>
    %cst_12 = arith.constant 0.000000e+00 : f32
    %36 = vector.broadcast %cst_12 : f32 to vector<16x128xf32>
    %37 = arith.select %34, %35, %36 : vector<16x128xi1>, vector<16x128xf32>
    %38 = vector.extract_strided_slice %3 {offsets = [1, 0], sizes = [1, 128], strides = [1, 1]} : vector<4x128xf32> to vector<1x128xf32>
    %39 = vector.broadcast %38 : vector<1x128xf32> to vector<16x128xf32>
    %40 = arith.mulf %37, %39 : vector<16x128xf32>
    %41 = arith.addf %32, %40 : vector<16x128xf32>
    %c3_i32 = arith.constant 3 : i32
    %42 = vector.broadcast %c3_i32 : i32 to vector<16x128xi32>
    %43 = arith.cmpi sge, %20, %42 : vector<16x128xi32>
    %c3_i32_13 = arith.constant 3 : i32
    %44 = tpu.dynamic_rotate %2 by %c3_i32_13 dim 0 : vector<16x128xf32>, i32 -> vector<16x128xf32>
    %cst_14 = arith.constant 0.000000e+00 : f32
    %45 = vector.broadcast %cst_14 : f32 to vector<16x128xf32>
    %46 = arith.select %43, %44, %45 : vector<16x128xi1>, vector<16x128xf32>
    %47 = vector.extract_strided_slice %3 {offsets = [0, 0], sizes = [1, 128], strides = [1, 1]} : vector<4x128xf32> to vector<1x128xf32>
    %48 = vector.broadcast %47 : vector<1x128xf32> to vector<16x128xf32>
    %49 = arith.mulf %46, %48 : vector<16x128xf32>
    %50 = arith.addf %41, %49 : vector<16x128xf32>
    %51 = tpu.iota {dimensions = array<i32: 1>} : vector<16x128xi32>
    %52 = arith.negf %50 : vector<16x128xf32>
    %53 = math.exp %52 : vector<16x128xf32>
    %cst_15 = arith.constant 1.000000e+00 : f32
    %54 = vector.broadcast %cst_15 : f32 to vector<16x128xf32>
    %55 = arith.addf %54, %53 : vector<16x128xf32>
    %56 = arith.divf %54, %55 : vector<16x128xf32>
    %c96_i32 = arith.constant 96 : i32
    %57 = vector.broadcast %c96_i32 : i32 to vector<16x128xi32>
    %58 = arith.cmpi slt, %51, %57 : vector<16x128xi32>
    %59 = arith.mulf %50, %56 : vector<16x128xf32>
    %60 = arith.select %58, %59, %56 : vector<16x128xi1>, vector<16x128xf32>
    %c96_i32_16 = arith.constant 96 : i32
    %61 = vector.broadcast %c96_i32_16 : i32 to vector<16x128xi32>
    %62 = arith.cmpi slt, %51, %61 : vector<16x128xi32>
    %63 = arith.truncf %60 : vector<16x128xf32> to vector<16x128xbf16>
    %64 = arith.extf %63 : vector<16x128xbf16> to vector<16x128xf32>
    %65 = arith.select %62, %64, %60 : vector<16x128xi1>, vector<16x128xf32>
    %66 = arith.mulf %65, %65 : vector<16x128xf32>
    %c0_17 = arith.constant 0 : index
    %c0_18 = arith.constant 0 : index
    %67 = vector.load %arg4[%c0_17, %c0_18] : memref<128x128xf32, #tpu.memory_space<vmem>>, vector<128x128xf32>
    %cst_19 = arith.constant dense<0.000000e+00> : vector<16x128xf32>
    %68 = tpu.matmul %66, %67, %cst_19 {dimension_numbers = #tpu.dot_dimension_numbers<[1], [0], [0], [1], [0, 0, 1, 1], [], []>} : vector<16x128xf32>, vector<128x128xf32>, vector<16x128xf32> -> vector<16x128xf32>
    %69 = math.sqrt %68 : vector<16x128xf32>
    %cst_20 = arith.constant 9.99999997E-7 : f32
    %70 = vector.broadcast %cst_20 : f32 to vector<16x128xf32>
    %71 = arith.addf %69, %70 : vector<16x128xf32>
    %72 = tpu.reciprocal %71 {approx = true} : vector<16x128xf32> -> vector<16x128xf32>
    %c64_i32 = arith.constant 64 : i32
    %73 = vector.broadcast %c64_i32 : i32 to vector<16x128xi32>
    %74 = arith.cmpi slt, %51, %73 : vector<16x128xi32>
    %cst_21 = arith.constant 1.000000e+00 : f32
    %75 = vector.broadcast %cst_21 : f32 to vector<16x128xf32>
    %76 = arith.select %74, %72, %75 : vector<16x128xi1>, vector<16x128xf32>
    %c32_i32 = arith.constant 32 : i32
    %77 = vector.broadcast %c32_i32 : i32 to vector<16x128xi32>
    %78 = arith.cmpi slt, %51, %77 : vector<16x128xi32>
    %cst_22 = arith.constant 0.353553385 : f32
    %cst_23 = arith.constant 1.000000e+00 : f32
    %79 = vector.broadcast %cst_22 : f32 to vector<16x128xf32>
    %80 = vector.broadcast %cst_23 : f32 to vector<16x128xf32>
    %81 = arith.select %78, %79, %80 : vector<16x128xi1>, vector<16x128xf32>
    %82 = arith.mulf %76, %81 : vector<16x128xf32>
    %83 = arith.mulf %65, %82 : vector<16x128xf32>
    %c0_24 = arith.constant 0 : index
    %c0_25 = arith.constant 0 : index
    %84 = vector.load %arg5[%c0_24, %c0_25] : memref<16x128xf32, #tpu.memory_space<vmem>>, vector<16x128xf32>
    tpu.vector_store %arg5[%c0_24, %c0_25], %83 {strides = array<i32>} : memref<16x128xf32, #tpu.memory_space<vmem>>, vector<16x128xf32>,
    return
  }
  func.func @transform_0(%arg0: i32) -> (i32, i32) {
    %c0_i32 = arith.constant 0 : i32
    %c0_i32_0 = arith.constant 0 : i32
    %c0_i32_1 = arith.constant 0 : i32
    return %c0_i32, %c0_i32_0 : i32, i32
  }
  func.func @transform_1(%arg0: i32) -> (i32, i32) {
    %c0_i32 = arith.constant 0 : i32
    %c0_i32_0 = arith.constant 0 : i32
    %c0_i32_1 = arith.constant 0 : i32
    return %c0_i32, %c0_i32_0 : i32, i32
  }
  func.func @transform_2(%arg0: i32) -> (i32, i32) {
    %c0_i32 = arith.constant 0 : i32
    %c0_i32_0 = arith.constant 0 : i32
    %c0_i32_1 = arith.constant 0 : i32
    return %c0_i32, %c0_i32_0 : i32, i32
  }
  func.func @transform_3(%arg0: i32) -> (i32, i32) {
    %c0_i32 = arith.constant 0 : i32
    %c0_i32_0 = arith.constant 0 : i32
    %c0_i32_1 = arith.constant 0 : i32
    return %c0_i32, %c0_i32_0 : i32, i32
  }
  func.func @transform_4(%arg0: i32) -> (i32, i32) {
    %c0_i32 = arith.constant 0 : i32
    %c0_i32_0 = arith.constant 0 : i32
    %c0_i32_1 = arith.constant 0 : i32
    return %c0_i32, %c0_i32_0 : i32, i32
  }
}

module attributes {stable_mosaic.version = 11 : i64} {
  func.func @_delta_recur_kernel(%arg0: i32, %arg1: memref<64x8xf32, #tpu.memory_space<vmem>>, %arg2: memref<64x8xf32, #tpu.memory_space<vmem>>, %arg3: memref<8x64xf32, #tpu.memory_space<vmem>>, %arg4: memref<8x8xf32, #tpu.memory_space<vmem>>, %arg5: memref<8x64xf32, #tpu.memory_space<vmem>>, %arg6: memref<64x64xf32, #tpu.memory_space<vmem>>, %arg7: memref<1x64xf32, #tpu.memory_space<vmem>>, %arg8: memref<64x128xf32, #tpu.memory_space<vmem>>, %arg9: memref<8x128xf32, #tpu.memory_space<vmem>>) attributes {dimension_semantics = [#tpu.dimension_semantics<arbitrary>], iteration_bounds = array<i64: 1>, scalar_prefetch = 0 : i64, scratch_operands = 0 : i64, tpu.core_type = #tpu.core_type<tc>, window_params = [{pipeline_mode = #tpu.pipeline_mode<synchronous>, transform_indices = @transform_0, window_bounds = array<i64: 64, 8>}, {pipeline_mode = #tpu.pipeline_mode<synchronous>, transform_indices = @transform_1, window_bounds = array<i64: 64, 8>}, {pipeline_mode = #tpu.pipeline_mode<synchronous>, transform_indices = @transform_2, window_bounds = array<i64: 8, 64>}, {pipeline_mode = #tpu.pipeline_mode<synchronous>, transform_indices = @transform_3, window_bounds = array<i64: 8, 8>}, {pipeline_mode = #tpu.pipeline_mode<synchronous>, transform_indices = @transform_4, window_bounds = array<i64: 8, 64>}, {pipeline_mode = #tpu.pipeline_mode<synchronous>, transform_indices = @transform_5, window_bounds = array<i64: 64, 64>}, {pipeline_mode = #tpu.pipeline_mode<synchronous>, transform_indices = @transform_6, window_bounds = array<i64: 1, 64>}, {pipeline_mode = #tpu.pipeline_mode<synchronous>, transform_indices = @transform_7, window_bounds = array<i64: 64, 128>}, {pipeline_mode = #tpu.pipeline_mode<synchronous>, transform_indices = @transform_8, window_bounds = array<i64: 8, 128>}]} {
    %c0 = arith.constant 0 : index
    %c0_0 = arith.constant 0 : index
    %0 = vector.load %arg5[%c0, %c0_0] : memref<8x64xf32, #tpu.memory_space<vmem>>, vector<8x64xf32>
    %c0_1 = arith.constant 0 : index
    %c0_2 = arith.constant 0 : index
    %1 = vector.load %arg1[%c0_1, %c0_2] : memref<64x8xf32, #tpu.memory_space<vmem>>, vector<64x8xf32>
    %cst = arith.constant dense<0.000000e+00> : vector<64x64xf32>
    %2 = tpu.matmul %1, %0, %cst {dimension_numbers = #tpu.dot_dimension_numbers<[1], [0], [0], [1], [0, 0, 1, 1], [], []>} : vector<64x8xf32>, vector<8x64xf32>, vector<64x64xf32> -> vector<64x64xf32>
    %c0_3 = arith.constant 0 : index
    %c0_4 = arith.constant 0 : index
    %3 = vector.load %arg2[%c0_3, %c0_4] : memref<64x8xf32, #tpu.memory_space<vmem>>, vector<64x8xf32>
    %cst_5 = arith.constant dense<0.000000e+00> : vector<64x64xf32>
    %4 = tpu.matmul %3, %0, %cst_5 {dimension_numbers = #tpu.dot_dimension_numbers<[1], [0], [0], [1], [0, 0, 1, 1], [], []>} : vector<64x8xf32>, vector<8x64xf32>, vector<64x64xf32> -> vector<64x64xf32>
    %c0_6 = arith.constant 0 : index
    %c0_7 = arith.constant 0 : index
    %5 = vector.load %arg4[%c0_6, %c0_7] : memref<8x8xf32, #tpu.memory_space<vmem>>, vector<8x8xf32>
    %cst_8 = arith.constant dense<0.000000e+00> : vector<8x64xf32>
    %6 = tpu.matmul %5, %0, %cst_8 {dimension_numbers = #tpu.dot_dimension_numbers<[1], [0], [0], [1], [0, 0, 1, 1], [], []>} : vector<8x8xf32>, vector<8x64xf32>, vector<8x64xf32> -> vector<8x64xf32>
    %c0_9 = arith.constant 0 : index
    %c0_10 = arith.constant 0 : index
    %7 = vector.load %arg3[%c0_9, %c0_10] : memref<8x64xf32, #tpu.memory_space<vmem>>, vector<8x64xf32>
    %cst_11 = arith.constant 0.000000e+00 : f32
    %8 = vector.broadcast %cst_11 : f32 to vector<8x64xf32>
    %9 = vector.extract_strided_slice %4 {offsets = [0, 0], sizes = [8, 64], strides = [1, 1]} : vector<64x64xf32> to vector<8x64xf32>
    %10 = vector.extract_strided_slice %2 {offsets = [0, 0], sizes = [8, 64], strides = [1, 1]} : vector<64x64xf32> to vector<8x64xf32>
    %11 = vector.extract_strided_slice %7 {offsets = [0, 0], sizes = [1, 64], strides = [1, 1]} : vector<8x64xf32> to vector<1x64xf32>
    %12 = vector.extract_strided_slice %6 {offsets = [0, 0], sizes = [1, 64], strides = [1, 1]} : vector<8x64xf32> to vector<1x64xf32>
    %13 = arith.mulf %9, %8 : vector<8x64xf32>
    %cst_12 = arith.constant dense<0.000000e+00> : vector<64xf32>
    %14 = vector.multi_reduction <add>, %13, %cst_12 [0] : vector<8x64xf32> to vector<64xf32>
    %15 = vector.shape_cast %14 : vector<64xf32> to vector<1x64xf32>
    %16 = arith.subf %11, %15 : vector<1x64xf32>
    %17 = arith.mulf %16, %12 : vector<1x64xf32>
    %18 = vector.broadcast %17 : vector<1x64xf32> to vector<8x64xf32>
    %19 = arith.mulf %9, %18 : vector<8x64xf32>
    %20 = arith.addf %8, %19 : vector<8x64xf32>
    %21 = arith.mulf %10, %20 : vector<8x64xf32>
    %cst_13 = arith.constant dense<0.000000e+00> : vector<64xf32>
    %22 = vector.multi_reduction <add>, %21, %cst_13 [0] : vector<8x64xf32> to vector<64xf32>
    %23 = vector.shape_cast %22 : vector<64xf32> to vector<1x64xf32>
    %24 = vector.extract_strided_slice %4 {offsets = [8, 0], sizes = [8, 64], strides = [1, 1]} : vector<64x64xf32> to vector<8x64xf32>
    %25 = vector.extract_strided_slice %2 {offsets = [8, 0], sizes = [8, 64], strides = [1, 1]} : vector<64x64xf32> to vector<8x64xf32>
    %26 = vector.extract_strided_slice %7 {offsets = [1, 0], sizes = [1, 64], strides = [1, 1]} : vector<8x64xf32> to vector<1x64xf32>
    %27 = vector.extract_strided_slice %6 {offsets = [1, 0], sizes = [1, 64], strides = [1, 1]} : vector<8x64xf32> to vector<1x64xf32>
    %28 = arith.mulf %24, %20 : vector<8x64xf32>
    %cst_14 = arith.constant dense<0.000000e+00> : vector<64xf32>
    %29 = vector.multi_reduction <add>, %28, %cst_14 [0] : vector<8x64xf32> to vector<64xf32>
    %30 = vector.shape_cast %29 : vector<64xf32> to vector<1x64xf32>
    %31 = arith.subf %26, %30 : vector<1x64xf32>
    %32 = arith.mulf %31, %27 : vector<1x64xf32>
    %33 = vector.broadcast %32 : vector<1x64xf32> to vector<8x64xf32>
    %34 = arith.mulf %24, %33 : vector<8x64xf32>
    %35 = arith.addf %20, %34 : vector<8x64xf32>
    %36 = arith.mulf %25, %35 : vector<8x64xf32>
    %cst_15 = arith.constant dense<0.000000e+00> : vector<64xf32>
    %37 = vector.multi_reduction <add>, %36, %cst_15 [0] : vector<8x64xf32> to vector<64xf32>
    %38 = vector.shape_cast %37 : vector<64xf32> to vector<1x64xf32>
    %39 = vector.extract_strided_slice %4 {offsets = [16, 0], sizes = [8, 64], strides = [1, 1]} : vector<64x64xf32> to vector<8x64xf32>
    %40 = vector.extract_strided_slice %2 {offsets = [16, 0], sizes = [8, 64], strides = [1, 1]} : vector<64x64xf32> to vector<8x64xf32>
    %41 = vector.extract_strided_slice %7 {offsets = [2, 0], sizes = [1, 64], strides = [1, 1]} : vector<8x64xf32> to vector<1x64xf32>
    %42 = vector.extract_strided_slice %6 {offsets = [2, 0], sizes = [1, 64], strides = [1, 1]} : vector<8x64xf32> to vector<1x64xf32>
    %43 = arith.mulf %39, %35 : vector<8x64xf32>
    %cst_16 = arith.constant dense<0.000000e+00> : vector<64xf32>
    %44 = vector.multi_reduction <add>, %43, %cst_16 [0] : vector<8x64xf32> to vector<64xf32>
    %45 = vector.shape_cast %44 : vector<64xf32> to vector<1x64xf32>
    %46 = arith.subf %41, %45 : vector<1x64xf32>
    %47 = arith.mulf %46, %42 : vector<1x64xf32>
    %48 = vector.broadcast %47 : vector<1x64xf32> to vector<8x64xf32>
    %49 = arith.mulf %39, %48 : vector<8x64xf32>
    %50 = arith.addf %35, %49 : vector<8x64xf32>
    %51 = arith.mulf %40, %50 : vector<8x64xf32>
    %cst_17 = arith.constant dense<0.000000e+00> : vector<64xf32>
    %52 = vector.multi_reduction <add>, %51, %cst_17 [0] : vector<8x64xf32> to vector<64xf32>
    %53 = vector.shape_cast %52 : vector<64xf32> to vector<1x64xf32>
    %54 = vector.extract_strided_slice %4 {offsets = [24, 0], sizes = [8, 64], strides = [1, 1]} : vector<64x64xf32> to vector<8x64xf32>
    %55 = vector.extract_strided_slice %2 {offsets = [24, 0], sizes = [8, 64], strides = [1, 1]} : vector<64x64xf32> to vector<8x64xf32>
    %56 = vector.extract_strided_slice %7 {offsets = [3, 0], sizes = [1, 64], strides = [1, 1]} : vector<8x64xf32> to vector<1x64xf32>
    %57 = vector.extract_strided_slice %6 {offsets = [3, 0], sizes = [1, 64], strides = [1, 1]} : vector<8x64xf32> to vector<1x64xf32>
    %58 = arith.mulf %54, %50 : vector<8x64xf32>
    %cst_18 = arith.constant dense<0.000000e+00> : vector<64xf32>
    %59 = vector.multi_reduction <add>, %58, %cst_18 [0] : vector<8x64xf32> to vector<64xf32>
    %60 = vector.shape_cast %59 : vector<64xf32> to vector<1x64xf32>
    %61 = arith.subf %56, %60 : vector<1x64xf32>
    %62 = arith.mulf %61, %57 : vector<1x64xf32>
    %63 = vector.broadcast %62 : vector<1x64xf32> to vector<8x64xf32>
    %64 = arith.mulf %54, %63 : vector<8x64xf32>
    %65 = arith.addf %50, %64 : vector<8x64xf32>
    %66 = arith.mulf %55, %65 : vector<8x64xf32>
    %cst_19 = arith.constant dense<0.000000e+00> : vector<64xf32>
    %67 = vector.multi_reduction <add>, %66, %cst_19 [0] : vector<8x64xf32> to vector<64xf32>
    %68 = vector.shape_cast %67 : vector<64xf32> to vector<1x64xf32>
    %69 = vector.extract_strided_slice %4 {offsets = [32, 0], sizes = [8, 64], strides = [1, 1]} : vector<64x64xf32> to vector<8x64xf32>
    %70 = vector.extract_strided_slice %2 {offsets = [32, 0], sizes = [8, 64], strides = [1, 1]} : vector<64x64xf32> to vector<8x64xf32>
    %71 = vector.extract_strided_slice %7 {offsets = [4, 0], sizes = [1, 64], strides = [1, 1]} : vector<8x64xf32> to vector<1x64xf32>
    %72 = vector.extract_strided_slice %6 {offsets = [4, 0], sizes = [1, 64], strides = [1, 1]} : vector<8x64xf32> to vector<1x64xf32>
    %73 = arith.mulf %69, %65 : vector<8x64xf32>
    %cst_20 = arith.constant dense<0.000000e+00> : vector<64xf32>
    %74 = vector.multi_reduction <add>, %73, %cst_20 [0] : vector<8x64xf32> to vector<64xf32>
    %75 = vector.shape_cast %74 : vector<64xf32> to vector<1x64xf32>
    %76 = arith.subf %71, %75 : vector<1x64xf32>
    %77 = arith.mulf %76, %72 : vector<1x64xf32>
    %78 = vector.broadcast %77 : vector<1x64xf32> to vector<8x64xf32>
    %79 = arith.mulf %69, %78 : vector<8x64xf32>
    %80 = arith.addf %65, %79 : vector<8x64xf32>
    %81 = arith.mulf %70, %80 : vector<8x64xf32>
    %cst_21 = arith.constant dense<0.000000e+00> : vector<64xf32>
    %82 = vector.multi_reduction <add>, %81, %cst_21 [0] : vector<8x64xf32> to vector<64xf32>
    %83 = vector.shape_cast %82 : vector<64xf32> to vector<1x64xf32>
    %84 = vector.extract_strided_slice %4 {offsets = [40, 0], sizes = [8, 64], strides = [1, 1]} : vector<64x64xf32> to vector<8x64xf32>
    %85 = vector.extract_strided_slice %2 {offsets = [40, 0], sizes = [8, 64], strides = [1, 1]} : vector<64x64xf32> to vector<8x64xf32>
    %86 = vector.extract_strided_slice %7 {offsets = [5, 0], sizes = [1, 64], strides = [1, 1]} : vector<8x64xf32> to vector<1x64xf32>
    %87 = vector.extract_strided_slice %6 {offsets = [5, 0], sizes = [1, 64], strides = [1, 1]} : vector<8x64xf32> to vector<1x64xf32>
    %88 = arith.mulf %84, %80 : vector<8x64xf32>
    %cst_22 = arith.constant dense<0.000000e+00> : vector<64xf32>
    %89 = vector.multi_reduction <add>, %88, %cst_22 [0] : vector<8x64xf32> to vector<64xf32>
    %90 = vector.shape_cast %89 : vector<64xf32> to vector<1x64xf32>
    %91 = arith.subf %86, %90 : vector<1x64xf32>
    %92 = arith.mulf %91, %87 : vector<1x64xf32>
    %93 = vector.broadcast %92 : vector<1x64xf32> to vector<8x64xf32>
    %94 = arith.mulf %84, %93 : vector<8x64xf32>
    %95 = arith.addf %80, %94 : vector<8x64xf32>
    %96 = arith.mulf %85, %95 : vector<8x64xf32>
    %cst_23 = arith.constant dense<0.000000e+00> : vector<64xf32>
    %97 = vector.multi_reduction <add>, %96, %cst_23 [0] : vector<8x64xf32> to vector<64xf32>
    %98 = vector.shape_cast %97 : vector<64xf32> to vector<1x64xf32>
    %99 = vector.extract_strided_slice %4 {offsets = [48, 0], sizes = [8, 64], strides = [1, 1]} : vector<64x64xf32> to vector<8x64xf32>
    %100 = vector.extract_strided_slice %2 {offsets = [48, 0], sizes = [8, 64], strides = [1, 1]} : vector<64x64xf32> to vector<8x64xf32>
    %101 = vector.extract_strided_slice %7 {offsets = [6, 0], sizes = [1, 64], strides = [1, 1]} : vector<8x64xf32> to vector<1x64xf32>
    %102 = vector.extract_strided_slice %6 {offsets = [6, 0], sizes = [1, 64], strides = [1, 1]} : vector<8x64xf32> to vector<1x64xf32>
    %103 = arith.mulf %99, %95 : vector<8x64xf32>
    %cst_24 = arith.constant dense<0.000000e+00> : vector<64xf32>
    %104 = vector.multi_reduction <add>, %103, %cst_24 [0] : vector<8x64xf32> to vector<64xf32>
    %105 = vector.shape_cast %104 : vector<64xf32> to vector<1x64xf32>
    %106 = arith.subf %101, %105 : vector<1x64xf32>
    %107 = arith.mulf %106, %102 : vector<1x64xf32>
    %108 = vector.broadcast %107 : vector<1x64xf32> to vector<8x64xf32>
    %109 = arith.mulf %99, %108 : vector<8x64xf32>
    %110 = arith.addf %95, %109 : vector<8x64xf32>
    %111 = arith.mulf %100, %110 : vector<8x64xf32>
    %cst_25 = arith.constant dense<0.000000e+00> : vector<64xf32>
    %112 = vector.multi_reduction <add>, %111, %cst_25 [0] : vector<8x64xf32> to vector<64xf32>
    %113 = vector.shape_cast %112 : vector<64xf32> to vector<1x64xf32>
    %114 = vector.extract_strided_slice %4 {offsets = [56, 0], sizes = [8, 64], strides = [1, 1]} : vector<64x64xf32> to vector<8x64xf32>
    %115 = vector.extract_strided_slice %2 {offsets = [56, 0], sizes = [8, 64], strides = [1, 1]} : vector<64x64xf32> to vector<8x64xf32>
    %116 = vector.extract_strided_slice %7 {offsets = [7, 0], sizes = [1, 64], strides = [1, 1]} : vector<8x64xf32> to vector<1x64xf32>
    %117 = vector.extract_strided_slice %6 {offsets = [7, 0], sizes = [1, 64], strides = [1, 1]} : vector<8x64xf32> to vector<1x64xf32>
    %118 = arith.mulf %114, %110 : vector<8x64xf32>
    %cst_26 = arith.constant dense<0.000000e+00> : vector<64xf32>
    %119 = vector.multi_reduction <add>, %118, %cst_26 [0] : vector<8x64xf32> to vector<64xf32>
    %120 = vector.shape_cast %119 : vector<64xf32> to vector<1x64xf32>
    %121 = arith.subf %116, %120 : vector<1x64xf32>
    %122 = arith.mulf %121, %117 : vector<1x64xf32>
    %123 = vector.broadcast %122 : vector<1x64xf32> to vector<8x64xf32>
    %124 = arith.mulf %114, %123 : vector<8x64xf32>
    %125 = arith.addf %110, %124 : vector<8x64xf32>
    %126 = arith.mulf %115, %125 : vector<8x64xf32>
    %cst_27 = arith.constant dense<0.000000e+00> : vector<64xf32>
    %127 = vector.multi_reduction <add>, %126, %cst_27 [0] : vector<8x64xf32> to vector<64xf32>
    %128 = vector.shape_cast %127 : vector<64xf32> to vector<1x64xf32>
    %129 = tpu.concatenate %23, %38, %53, %68, %83, %98, %113, %128 in 0 : vector<1x64xf32>, vector<1x64xf32>, vector<1x64xf32>, vector<1x64xf32>, vector<1x64xf32>, vector<1x64xf32>, vector<1x64xf32>, vector<1x64xf32> -> vector<8x64xf32>
    %130 = arith.truncf %129 : vector<8x64xf32> to vector<8x64xbf16>
    %131 = arith.extf %130 : vector<8x64xbf16> to vector<8x64xf32>
    %132 = arith.mulf %131, %131 : vector<8x64xf32>
    %c0_28 = arith.constant 0 : index
    %c0_29 = arith.constant 0 : index
    %133 = vector.load %arg6[%c0_28, %c0_29] : memref<64x64xf32, #tpu.memory_space<vmem>>, vector<64x64xf32>
    %cst_30 = arith.constant dense<0.000000e+00> : vector<8x64xf32>
    %134 = tpu.matmul %132, %133, %cst_30 {dimension_numbers = #tpu.dot_dimension_numbers<[1], [0], [0], [1], [0, 0, 1, 1], [], []>} : vector<8x64xf32>, vector<64x64xf32>, vector<8x64xf32> -> vector<8x64xf32>
    %cst_31 = arith.constant 1.250000e-01 : f32
    %135 = vector.broadcast %cst_31 : f32 to vector<8x64xf32>
    %136 = arith.mulf %134, %135 : vector<8x64xf32>
    %cst_32 = arith.constant 9.99999974E-6 : f32
    %137 = vector.broadcast %cst_32 : f32 to vector<8x64xf32>
    %138 = arith.addf %136, %137 : vector<8x64xf32>
    %139 = math.rsqrt %138 : vector<8x64xf32>
    %140 = arith.mulf %131, %139 : vector<8x64xf32>
    %c0_33 = arith.constant 0 : index
    %c0_34 = arith.constant 0 : index
    %141 = vector.load %arg7[%c0_33, %c0_34] : memref<1x64xf32, #tpu.memory_space<vmem>>, vector<1x64xf32>
    %142 = vector.broadcast %141 : vector<1x64xf32> to vector<8x64xf32>
    %143 = arith.mulf %140, %142 : vector<8x64xf32>
    %c0_35 = arith.constant 0 : index
    %c0_36 = arith.constant 0 : index
    %144 = vector.load %arg8[%c0_35, %c0_36] : memref<64x128xf32, #tpu.memory_space<vmem>>, vector<64x128xf32>
    %cst_37 = arith.constant dense<0.000000e+00> : vector<8x128xf32>
    %145 = tpu.matmul %143, %144, %cst_37 {dimension_numbers = #tpu.dot_dimension_numbers<[1], [0], [0], [1], [0, 0, 1, 1], [], []>} : vector<8x64xf32>, vector<64x128xf32>, vector<8x128xf32> -> vector<8x128xf32>
    %c0_38 = arith.constant 0 : index
    %c0_39 = arith.constant 0 : index
    %146 = vector.load %arg9[%c0_38, %c0_39] : memref<8x128xf32, #tpu.memory_space<vmem>>, vector<8x128xf32>
    tpu.vector_store %arg9[%c0_38, %c0_39], %145 {strides = array<i32>} : memref<8x128xf32, #tpu.memory_space<vmem>>, vector<8x128xf32>,
    return
  }
  func.func @transform_0(%arg0: i32) -> (i32, i32) {
    %c0_i32 = arith.constant 0 : i32
    %c0_i32_0 = arith.constant 0 : i32
    %c0_i32_1 = arith.constant 0 : i32
    return %c0_i32, %c0_i32_0 : i32, i32
  }
  func.func @transform_1(%arg0: i32) -> (i32, i32) {
    %c0_i32 = arith.constant 0 : i32
    %c0_i32_0 = arith.constant 0 : i32
    %c0_i32_1 = arith.constant 0 : i32
    return %c0_i32, %c0_i32_0 : i32, i32
  }
  func.func @transform_2(%arg0: i32) -> (i32, i32) {
    %c0_i32 = arith.constant 0 : i32
    %c0_i32_0 = arith.constant 0 : i32
    %c0_i32_1 = arith.constant 0 : i32
    return %c0_i32, %c0_i32_0 : i32, i32
  }
  func.func @transform_3(%arg0: i32) -> (i32, i32) {
    %c0_i32 = arith.constant 0 : i32
    %c0_i32_0 = arith.constant 0 : i32
    %c0_i32_1 = arith.constant 0 : i32
    return %c0_i32, %c0_i32_0 : i32, i32
  }
  func.func @transform_4(%arg0: i32) -> (i32, i32) {
    %c0_i32 = arith.constant 0 : i32
    %c0_i32_0 = arith.constant 0 : i32
    %c0_i32_1 = arith.constant 0 : i32
    return %c0_i32, %c0_i32_0 : i32, i32
  }
  func.func @transform_5(%arg0: i32) -> (i32, i32) {
    %c0_i32 = arith.constant 0 : i32
    %c0_i32_0 = arith.constant 0 : i32
    %c0_i32_1 = arith.constant 0 : i32
    return %c0_i32, %c0_i32_0 : i32, i32
  }
  func.func @transform_6(%arg0: i32) -> (i32, i32) {
    %c0_i32 = arith.constant 0 : i32
    %c0_i32_0 = arith.constant 0 : i32
    %c0_i32_1 = arith.constant 0 : i32
    return %c0_i32, %c0_i32_0 : i32, i32
  }
  func.func @transform_7(%arg0: i32) -> (i32, i32) {
    %c0_i32 = arith.constant 0 : i32
    %c0_i32_0 = arith.constant 0 : i32
    %c0_i32_1 = arith.constant 0 : i32
    return %c0_i32, %c0_i32_0 : i32, i32
  }
  func.func @transform_8(%arg0: i32) -> (i32, i32) {
    %c0_i32 = arith.constant 0 : i32
    %c0_i32_0 = arith.constant 0 : i32
    %c0_i32_1 = arith.constant 0 : i32
    return %c0_i32, %c0_i32_0 : i32, i32
  }
}

</mosaic_0001>

<bundles_post_ra>
// kernel: tile.8
= control target key start
LH: loop header
LB: loop body
LE: loop exit
PB: predicated region body
PF: predicated region fallthrough
CT: control target
= control target key end

     0   :  { %s22_s0 = inlined_call_operand.vmem [shape: f32[8], index: 0, kind: input, shape index: {}]   ;;  %s23_s1 = inlined_call_operand.vmem [shape: f32[8,8], index: 1, kind: output, shape index: {}]  }
   0x1   :  { %v4_v0 = vld [vmem:[%s22_s0] ss:$0 sm:$0xff] }
   0x2   :  { %5 = vst [vmem:[%s23_s1] sm:$0xff] %v4_v0 }

// kernel: tile.9
= control target key start
LH: loop header
LB: loop body
LE: loop exit
PB: predicated region body
PF: predicated region fallthrough
CT: control target
= control target key end

     0   :  { %s69_s10 = smov 56   ;;  %s70_s11 = smov 40   ;;  %vm3_vm0 = vcmask 64512   ;;  %vm9_vm1 = vcmask 523712   ;;  %vm15_vm2 = vcmask 458112   ;;  %vm21_vm3 = vcmask 392512   ;;  %s113_s0 = inlined_call_operand.vmem [shape: f32[8,8], index: 0, kind: input, shape index: {}]   ;;  %s114_s1 = inlined_call_operand.vmem [shape: f32[1,64], index: 1, kind: output, shape index: {}]  }
   0x1   :  { %v55_v0 = vld [vmem:[%s113_s0 + $0x7] sm:$0x1]   ;;  %v57_v1 = vld [vmem:[%s113_s0 + $0x5] sm:$0x1]   ;;  %v56_v2 = vld [vmem:[%s113_s0 + $0x6] sm:$0x1]  }
   0x2   :  { %7 = vrot.lane.b32.xlu0 %v55_v0, %s69_s10  ;;  %19 = vrot.lane.b32.xlu1 %v57_v1, %s70_s11  ;;  %v58_v3 = vld [vmem:[%s113_s0 + $0x4] sm:$0x1]   ;;  %v2_v4 = vld [vmem:[%s113_s0] sm:$0x1]   ;;  %s71_s18 = smov 48   ;;  %s72_s19 = smov 32  }
   0x3   :  { %4 = vst.msk [vmem:[#allocation0] sm:$0x1] %vm3_vm0, %v2_v4   ;;  %v59_v5 = vld [vmem:[%s113_s0 + $0x3] sm:$0x1]   ;;  %v60_v6 = vld [vmem:[%s113_s0 + $0x2] sm:$0x1]  }
   0x4   :  { %s73_s24 = smov 24   ;;  %s74_s25 = smov 16   ;;  %v61_v7 = vld [vmem:[%s113_s0 + $0x1] sm:$0x1]   ;;  %vm27_vm4 = vcmask 326912   ;;  %vm33_vm5 = vcmask 261312  }
   0x5   :  { %s75_s0 = smov 8   ;;  %vm39_vm6 = vcmask 195712   ;;  %vm45_vm7 = vcmask 130112  }
   0x6   :  { %13 = vrot.lane.b32.xlu0 %v56_v2, %s71_s18  ;;  %25 = vrot.lane.b32.xlu1 %v58_v3, %s72_s19 }
   0xa   :  { %31 = vrot.lane.b32.xlu0 %v59_v5, %s73_s24  ;;  %37 = vrot.lane.b32.xlu1 %v60_v6, %s74_s25 }
   0xe   :  { %43 = vrot.lane.b32.xlu0 %v61_v7, %s75_s0 }
  0x74   :  { %v8_v8 = vpop.permute.xlu0 %7   ;;  %v20_v9 = vpop.permute.xlu1 %19  }
  0x75   :  { %10 = vst.msk [vmem:[#allocation0] sm:$0x1] %vm9_vm1, %v8_v8  }
  0x78   :  { %v14_v10 = vpop.permute.xlu0 %13   ;;  %v26_v11 = vpop.permute.xlu1 %25  }
  0x79   :  { %16 = vst.msk [vmem:[#allocation0] sm:$0x1] %vm15_vm2, %v14_v10  }
  0x7a   :  { %22 = vst.msk [vmem:[#allocation0] sm:$0x1] %vm21_vm3, %v20_v9  }
  0x7b   :  { %28 = vst.msk [vmem:[#allocation0] sm:$0x1] %vm27_vm4, %v26_v11  }
  0x7c   :  { %v32_v12 = vpop.permute.xlu0 %31   ;;  %v38_v13 = vpop.permute.xlu1 %37  }
  0x7d   :  { %34 = vst.msk [vmem:[#allocation0] sm:$0x1] %vm33_vm5, %v32_v12  }
  0x7e   :  { %40 = vst.msk [vmem:[#allocation0] sm:$0x1] %vm39_vm6, %v38_v13  }
  0x80   :  { %v44_v14 = vpop.permute.xlu0 %43  }
  0x81   :  { %46 = vst.msk [vmem:[#allocation0] sm:$0x1] %vm45_vm7, %v44_v14  }
  0x88   :  { %v51_v15 = vld [vmem:[#allocation0] sm:$0x1] }
  0x89   :  { %54 = vst [vmem:[%s114_s1] sm:$0x1] %v51_v15 }

// kernel: delta_net_forward.2
= control target key start
LH: loop header
LB: loop body
LE: loop exit
PB: predicated region body
PF: predicated region fallthrough
CT: control target
= control target key end

     0   :  { %vm23_vm0 = vcmask 261120   ;;  %v106_v22 = vlaneseq  ;;  %s548_s1 = inlined_call_operand.vmem [shape: f32[32,128], index: 1, kind: input, shape index: {}]   ;;  %s549_s0 = inlined_call_operand.vmem [shape: f32[16,32], index: 0, kind: input, shape index: {}]   ;;  %s550_s3 = inlined_call_operand.vmem [shape: f32[128,128], index: 3, kind: input, shape index: {}]   ;;  %s551_s2 = inlined_call_operand.vmem [shape: f32[4,128], index: 2, kind: input, shape index: {}]   ;;  %s552_s4 = inlined_call_operand.vmem [shape: f32[16,128], index: 4, kind: output, shape index: {}]  }
   0x1   :  { %v22_v0 = vld [vmem:[%s548_s1 + $0x18] sm:$0xff]  ;;  %v21_v1 = vld [vmem:[%s548_s1 + $0x10] sm:$0xff]  ;;  %v17_v2 = vld [vmem:[%s549_s0] sm:$0xff] }
   0x2   :  { %368 = vmatprep.subr.mxu0 %v22_v0  ;;  %v20_v3 = vld [vmem:[%s548_s1 + $0x8] sm:$0xff]  ;;  %376 = vmatprep.mubr.msk.f32.mxu0 %vm23_vm0, %v17_v2  ;;  %v19_v4 = vld [vmem:[%s548_s1] sm:$0xff]  ;;  %v231_v6 = vld [vmem:[%s550_s3 + $0x78] sm:$0xff]  ;;  %v107_v23 = vshrl.u32 %v106_v22, 7 }
   0x3   :  { %369 = vmatpush3.msra.mxu0 %v22_v0  ;;  %v18_v5 = vld [vmem:[%s549_s0 + $0x8] sm:$0xff]  ;;  %379 = vmatprep.subr.mxu1 %v231_v6  ;;  %v230_v7 = vld [vmem:[%s550_s3 + $0x70] sm:$0xff]  ;;  %v228_v9 = vld [vmem:[%s550_s3 + $0x60] sm:$0xff] }
   0x4   :  { %370 = vmatprep.subr.mxu0 %v21_v1  ;;  %380 = vmatpush3.msra.mxu1 %v231_v6  ;;  %v229_v8 = vld [vmem:[%s550_s3 + $0x68] sm:$0xff]  ;;  %v227_v10 = vld [vmem:[%s550_s3 + $0x58] sm:$0xff]  ;;  %v226_v11 = vld [vmem:[%s550_s3 + $0x50] sm:$0xff]  ;;  %v108_v24 = vadd.s32 8, %v107_v23  ;;  %v113_v25 = vand.u32 7, %v107_v23  ;;  %v135_v26 = vsub.s32 3, %v107_v23 }
   0x5   :  { %371 = vmatpush3.msra.mxu0 %v21_v1  ;;  %381 = vmatprep.subr.mxu1 %v230_v7  ;;  %v225_v12 = vld [vmem:[%s550_s3 + $0x48] sm:$0xff]  ;;  %v224_v13 = vld [vmem:[%s550_s3 + $0x40] sm:$0xff]  ;;  %v223_v14 = vld [vmem:[%s550_s3 + $0x38] sm:$0xff]  ;;  %v150_v29 = vsub.s32 2, %v107_v23  ;;  %v167_v30 = vsub.s32 1, %v107_v23  ;;  %vm143_vm2 = vcmp.lt.s32.totalorder %v107_v23, 1 }
   0x6   :  { %372 = vmatprep.subr.mxu0 %v20_v3  ;;  %382 = vmatpush3.msra.mxu1 %v230_v7  ;;  %v222_v15 = vld [vmem:[%s550_s3 + $0x30] sm:$0xff]  ;;  %v221_v16 = vld [vmem:[%s550_s3 + $0x28] sm:$0xff]  ;;  %v220_v17 = vld [vmem:[%s550_s3 + $0x20] sm:$0xff]  ;;  %v120_v28 = vand.u32 7, %v108_v24  ;;  %vm139_vm1 = vcmp.ge.s32.totalorder %v113_v25, 1  ;;  %v184_v33 = vsub.s32 0, %v107_v23 }
   0x7   :  { %373 = vmatpush3.msra.mxu0 %v20_v3  ;;  %383 = vmatprep.subr.mxu1 %v229_v8  ;;  %v219_v18 = vld [vmem:[%s550_s3 + $0x18] sm:$0xff]  ;;  %v218_v19 = vld [vmem:[%s550_s3 + $0x10] sm:$0xff]  ;;  %v217_v20 = vld [vmem:[%s550_s3 + $0x8] sm:$0xff]  ;;  %vm160_vm4 = vcmp.lt.s32.totalorder %v107_v23, 2  ;;  %vm177_vm5 = vcmp.lt.s32.totalorder %v107_v23, 3  ;;  %vm156_vm6 = vcmp.ge.s32.totalorder %v113_v25, 2 }
   0x8   :  { %374 = vmatprep.subr.mxu0 %v19_v4  ;;  %384 = vmatpush3.msra.mxu1 %v229_v8  ;;  %v216_v21 = vld [vmem:[%s550_s3] sm:$0xff]  ;;  %vm140_vm3 = vcmp.ge.s32.totalorder %v120_v28, 1  ;;  %vm157_vm7 = vcmp.ge.s32.totalorder %v120_v28, 2  ;;  %vm173_vm8 = vcmp.ge.s32.totalorder %v113_v25, 3  ;;  %vm174_vm9 = vcmp.ge.s32.totalorder %v120_v28, 3 }
   0x9   :  { %375 = vmatpush3.msra.mxu0 %v19_v4  ;;  %385 = vmatprep.subr.mxu1 %v228_v9  ;;  %v105_v27 = vld [vmem:[%s551_s2] sm:$0xf] }
   0xa   :  { %377 = vmatmul.mubr.msk.f32.vlgmr.msra.gmra.mxu0 %vm23_vm0, %v18_v5  ;;  %386 = vmatpush3.msra.mxu1 %v228_v9  ;;  %v136_v32 = vrot.slane %v105_v27, %v135_v26  ;;  %v151_v34 = vrot.slane %v105_v27, %v150_v29  ;;  %v168_v36 = vrot.slane %v105_v27, %v167_v30 }
   0xb   :  { %387 = vmatprep.subr.mxu1 %v227_v10  ;;  %v185_v43 = vrot.slane %v105_v27, %v184_v33 }
   0xc   :  { %388 = vmatpush3.msra.mxu1 %v227_v10 }
   0xd   :  { %389 = vmatprep.subr.mxu1 %v226_v11 }
   0xe   :  { %390 = vmatpush3.msra.mxu1 %v226_v11 }
   0xf   :  { %391 = vmatprep.subr.mxu1 %v225_v12 }
  0x10   :  { %392 = vmatpush3.msra.mxu1 %v225_v12  ;;  %v191_v12 = vand.u32 127, %v106_v22 }
  0x11   :  { %393 = vmatprep.subr.mxu1 %v224_v13 }
  0x12   :  { %394 = vmatpush3.msra.mxu1 %v224_v13  ;;  %vm204_vm10 = vcmp.lt.s32.totalorder %v191_v12, 96  ;;  %vm328_vm15 = vcmp.lt.s32.totalorder %v191_v12, 32  ;;  %vm325_vm0 = vcmp.lt.s32.totalorder %v191_v12, 64 }
  0x13   :  { %395 = vmatprep.subr.mxu1 %v223_v14 }
  0x14   :  { %396 = vmatpush3.msra.mxu1 %v223_v14 }
  0x15   :  { %397 = vmatprep.subr.mxu1 %v222_v15 }
  0x16   :  { %398 = vmatpush3.msra.mxu1 %v222_v15 }
  0x17   :  { %399 = vmatprep.subr.mxu1 %v221_v16 }
  0x18   :  { %400 = vmatpush3.msra.mxu1 %v221_v16 }
  0x19   :  { %401 = vmatprep.subr.mxu1 %v220_v17 }
  0x1a   :  { %402 = vmatpush3.msra.mxu1 %v220_v17 }
  0x1b   :  { %403 = vmatprep.subr.mxu1 %v219_v18 }
  0x1c   :  { %404 = vmatpush3.msra.mxu1 %v219_v18 }
  0x1d   :  { %405 = vmatprep.subr.mxu1 %v218_v19 }
  0x1e   :  { %406 = vmatpush3.msra.mxu1 %v218_v19 }
  0x1f   :  { %407 = vmatprep.subr.mxu1 %v217_v20 }
  0x20   :  { %408 = vmatpush3.msra.mxu1 %v217_v20 }
  0x21   :  { %409 = vmatprep.subr.mxu1 %v216_v21 }
  0x22   :  { %410 = vmatpush3.msra.mxu1 %v216_v21 }
  0xca   :  { %v378_v31 = vpop.f32.mrf.mxu0 }
  0xcb   :  { %v142_v37 = vrot.slane %v378_v31, 7  ;;  %v159_v38 = vrot.slane %v378_v31, 6  ;;  %v176_v41 = vrot.slane %v378_v31, 5  ;;  %v138_v53 = vmul.f32 %v378_v31, %v136_v32 }
  0xcc   :  { %v96_v35 = vpop.f32.mrf.mxu0 }
  0xcd   :  { %v141_v39 = vrot.slane %v96_v35, 7  ;;  %v158_v40 = vrot.slane %v96_v35, 6  ;;  %v175_v42 = vrot.slane %v96_v35, 5  ;;  %v137_v52 = vmul.f32 %v136_v32, %v96_v35 }
  0xcf   :  { %v144_v44 = vsel %vm143_vm2, %v141_v39, %v142_v37  ;;  %v145_v45 = vsel %vm143_vm2, %v142_v37, %v141_v39  ;;  %v161_v46 = vsel %vm160_vm4, %v158_v40, %v159_v38  ;;  %v162_v47 = vsel %vm160_vm4, %v159_v38, %v158_v40 }
  0xd0   :  { %v146_v48 = vsel %vm139_vm1, %v145_v45, 0.0  ;;  %v147_v49 = vsel %vm140_vm3, %v144_v44, 0.0  ;;  %v163_v50 = vsel %vm156_vm6, %v162_v47, 0.0  ;;  %v164_v51 = vsel %vm157_vm7, %v161_v46, 0.0 }
  0xd1   :  { %v152_v54 = vmul.f32 %v151_v34, %v146_v48  ;;  %v153_v55 = vmul.f32 %v151_v34, %v147_v49  ;;  %v169_v56 = vmul.f32 %v168_v36, %v163_v50  ;;  %v170_v57 = vmul.f32 %v168_v36, %v164_v51 }
  0xd2   :  { %v178_v58 = vsel %vm177_vm5, %v175_v42, %v176_v41  ;;  %v179_v59 = vsel %vm177_vm5, %v176_v41, %v175_v42  ;;  %v431_v40 = vmov 1.0  }
  0xd3   :  { %v154_v60 = vadd.f32 %v152_v54, %v137_v52  ;;  %v155_v61 = vadd.f32 %v153_v55, %v138_v53  ;;  %v180_v62 = vsel %vm173_vm8, %v179_v59, 0.0  ;;  %v181_v63 = vsel %vm174_vm9, %v178_v58, 0.0 }
  0xd4   :  { %v186_v2 = vmul.f32 %v185_v43, %v180_v62  ;;  %v187_v3 = vmul.f32 %v185_v43, %v181_v63  ;;  %v329_v41 = vsel %vm328_vm15, 0.35355338, %v431_v40 }
  0xd5   :  { %v171_v0 = vadd.f32 %v169_v56, %v154_v60  ;;  %v172_v1 = vadd.f32 %v170_v57, %v155_v61 }
  0xd7   :  { %v188_v4 = vadd.f32 %v186_v2, %v171_v0  ;;  %v189_v5 = vadd.f32 %v187_v3, %v172_v1 }
  0xd9   :  { %v342_v6 = vmul.f32 -1.442695, %v188_v4  ;;  %v343_v7 = vmul.f32 -1.442695, %v189_v5 }
  0xdb   :  { %415 = vpow2.f32 %v342_v6 }
  0xdc   :  { %417 = vpow2.f32 %v343_v7 }
  0xe8   :  { %v416_v8 = vpop.eup %415 }
  0xe9   :  { %v418_v9 = vpop.eup %417  ;;  %v198_v10 = vadd.f32 1.0, %v416_v8 }
  0xea   :  { %v199_v11 = vadd.f32 1.0, %v418_v9 }
  0xeb   :  { %419 = vrcp.f32 %v198_v10 }
  0xec   :  { %421 = vrcp.f32 %v199_v11 }
  0xf8   :  { %v420_v13 = vpop.eup %419 }
  0xf9   :  { %v422_v14 = vpop.eup %421  ;;  %v205_v15 = vmul.f32 %v420_v13, %v188_v4 }
  0xfa   :  { %v206_v16 = vmul.f32 %v422_v14, %v189_v5 }
  0xfb   :  { %v207_v17 = vsel %vm204_vm10, %v205_v15, %v420_v13 }
  0xfc   :  { %v208_v18 = vsel %vm204_vm10, %v206_v16, %v422_v14 }
  0xfd   :  { %v209_v19 = vpack.c.bf16 %v208_v18, %v207_v17 }
  0xff   :  { %v210_v20 = vunpack.c.l.bf16 %v209_v19  ;;  %v211_v21 = vunpack.c.h.bf16 %v209_v19 }
 0x101   :  { %v212_v23 = vsel %vm204_vm10, %v210_v20, %v420_v13  ;;  %v213_v24 = vsel %vm204_vm10, %v211_v21, %v422_v14 }
 0x102   :  { %v214_v25 = vmul.f32 %v212_v23, %v212_v23  ;;  %v215_v26 = vmul.f32 %v213_v24, %v213_v24 }
 0x104   :  { %411 = vmatprep.mubr.f32.mxu1 %v214_v25 }
 0x105   :  { %412 = vmatmul.mubr.f32.vlgmr.msra.gmra.mxu1 %v215_v26 }
 0x1c5   :  { %v413_v27 = vpop.f32.mrf.mxu1 }
 0x1c6   :  { %423 = vrsqrt.f32 %v413_v27  ;;  %vm316_vm11 = vcmp.eq.f32.partialorder %v413_v27, inf  ;;  %v319_v31 = vand.u32 2147483648, %v413_v27  ;;  %vm318_vm12 = vcmp.eq.f32.partialorder %v413_v27, 0.0 }
 0x1c7   :  { %v298_v28 = vpop.f32.mrf.mxu1 }
 0x1c8   :  { %425 = vrsqrt.f32 %v298_v28  ;;  %vm309_vm13 = vcmp.eq.f32.partialorder %v298_v28, inf  ;;  %v312_v35 = vand.u32 2147483648, %v298_v28  ;;  %vm311_vm14 = vcmp.eq.f32.partialorder %v298_v28, 0.0 }
 0x1d3   :  { %v424_v22 = vpop.eup %423 }
 0x1d4   :  { %v315_v29 = vmul.f32 %v424_v22, %v413_v27 }
 0x1d5   :  { %v426_v30 = vpop.eup %425 }
 0x1d6   :  { %v317_v32 = vsel %vm316_vm11, %v413_v27, %v315_v29  ;;  %v308_v33 = vmul.f32 %v426_v30, %v298_v28 }
 0x1d7   :  { %v320_v34 = vsel %vm318_vm12, %v319_v31, %v317_v32 }
 0x1d8   :  { %v322_v36 = vadd.f32 1e-06, %v320_v34  ;;  %v310_v37 = vsel %vm309_vm13, %v298_v28, %v308_v33 }
 0x1d9   :  { %v313_v38 = vsel %vm311_vm14, %v312_v35, %v310_v37 }
 0x1da   :  { %427 = vrcp.f32 %v322_v36  ;;  %v321_v39 = vadd.f32 1e-06, %v313_v38 }
 0x1dc   :  { %429 = vrcp.f32 %v321_v39 }
 0x1e7   :  { %v428_v42 = vpop.eup %427 }
 0x1e8   :  { %v327_v43 = vsel %vm325_vm0, %v428_v42, 1.0 }
 0x1e9   :  { %v430_v44 = vpop.eup %429  ;;  %v331_v45 = vmul.f32 %v329_v41, %v327_v43 }
 0x1ea   :  { %v326_v46 = vsel %vm325_vm0, %v430_v44, 1.0 }
 0x1eb   :  { %v333_v47 = vmul.f32 %v331_v45, %v213_v24  ;;  %v330_v48 = vmul.f32 %v329_v41, %v326_v46 }
 0x1ed   :  { %v332_v49 = vmul.f32 %v330_v48, %v212_v23  ;;  %335 = vst [vmem:[%s552_s4 + $0x8] sm:$0xff] %v333_v47 }
 0x1ef   :  { %334 = vst [vmem:[%s552_s4] sm:$0xff] %v332_v49 }

// kernel: delta_net_forward.3
= control target key start
LH: loop header
LB: loop body
LE: loop exit
PB: predicated region body
PF: predicated region fallthrough
CT: control target
= control target key end

     0   :  { %vm38_vm0 = vcmask 64512   ;;  %v904_v9 = vmov 0.0   ;;  %vm905_vm1 = vmmov 0   ;;  %vm381_vm2 = vcmask 523264   ;;  %s1175_s4 = inlined_call_operand.vmem [shape: f32[8,64], index: 4, kind: input, shape index: {}]   ;;  %s1176_s0 = inlined_call_operand.vmem [shape: f32[64,8], index: 0, kind: input, shape index: {}]   ;;  %s1177_s1 = inlined_call_operand.vmem [shape: f32[64,8], index: 1, kind: input, shape index: {}]   ;;  %s1178_s3 = inlined_call_operand.vmem [shape: f32[8,8], index: 3, kind: input, shape index: {}]   ;;  %s1179_s2 = inlined_call_operand.vmem [shape: f32[8,64], index: 2, kind: input, shape index: {}]   ;;  %s1180_s5 = inlined_call_operand.vmem [shape: f32[64,64], index: 5, kind: input, shape index: {}]   ;;  %s1181_s7 = inlined_call_operand.vmem [shape: f32[64,128], index: 7, kind: input, shape index: {}]   ;;  %s1182_s6 = inlined_call_operand.vmem [shape: f32[1,64], index: 6, kind: input, shape index: {}]   ;;  %s1183_s8 = inlined_call_operand.vmem [shape: f32[8,128], index: 8, kind: output, shape index: {}]  }
   0x1   :  { %v29_v0 = vld [vmem:[%s1175_s4] sm:$0xff]  ;;  %v35_v2 = vld [vmem:[%s1176_s0 + $0x28] sm:$0xff]  ;;  %v36_v3 = vld [vmem:[%s1176_s0 + $0x30] sm:$0xff]  ;;  %v391_v36 = vlaneseq  ;;  %vm573_vm3 = vcmask 1040384   ;;  %vm575_vm4 = vcmask 1041408   ;;  %vm577_vm5 = vcmask 1042432  }
   0x2   :  { %v34_v1 = vld [vmem:[%s1176_s0 + $0x20] sm:$0xff]  ;;  %898 = vmatprep.subr.mxu1 %v29_v0  ;;  %827 = vmatprep.subr.mxu0 %v29_v0  ;;  %v31_v5 = vld [vmem:[%s1176_s0 + $0x8] sm:$0xff]  ;;  %v37_v6 = vld [vmem:[%s1176_s0 + $0x38] sm:$0xff]  ;;  %vm579_vm6 = vcmask 1043456   ;;  %vm581_vm7 = vcmask 1044480   ;;  %vm583_vm8 = vcmask 1045504  }
   0x3   :  { %835 = vmatprep.mubr.msk.f32.mxu1 %vm38_vm0, %v34_v1  ;;  %899 = vmatpush3.msra.mxu1 %v29_v0  ;;  %v30_v4 = vld [vmem:[%s1176_s0] sm:$0xff]  ;;  %v32_v8 = vld [vmem:[%s1176_s0 + $0x10] sm:$0xff]  ;;  %v33_v10 = vld [vmem:[%s1176_s0 + $0x18] sm:$0xff]  ;;  %v1046_v39 = vshrl.u32 %v391_v36, 7  ;;  %vm585_vm9 = vcmask 1046528  }
   0x4   :  { %836 = vmatmul.mubr.msk.f32.vlgmr.msra.gmra.mxu1 %vm38_vm0, %v35_v2  ;;  %841 = vmatprep.subr.mxu1 %v29_v0  ;;  %v168_v7 = vld [vmem:[%s1177_s1] sm:$0xff]  ;;  %v169_v11 = vld [vmem:[%s1177_s1 + $0x8] sm:$0xff]  ;;  %v170_v12 = vld [vmem:[%s1177_s1 + $0x10] sm:$0xff] }
   0x5   :  { %842 = vmatpush3.msra.mxu1 %v29_v0  ;;  %838 = vmatprep.mubr.msk.f32.mxu1 %vm38_vm0, %v36_v3  ;;  %v305_v13 = vld [vmem:[%s1178_s3] sm:$0xff]  ;;  %v171_v14 = vld [vmem:[%s1177_s1 + $0x18] sm:$0xff]  ;;  %v173_v16 = vld [vmem:[%s1177_s1 + $0x28] sm:$0xff]  ;;  %v393_v43 = vsub.s32 0, %v1046_v39  ;;  %v417_v58 = vsub.s32 1, %v1046_v39 }
   0x6   :  { %828 = vmatpush3.msra.mxu0 %v29_v0  ;;  %829 = vmatprep.mubr.msk.f32.mxu0 %vm38_vm0, %v30_v4  ;;  %v172_v15 = vld [vmem:[%s1177_s1 + $0x20] sm:$0xff]  ;;  %v174_v17 = vld [vmem:[%s1177_s1 + $0x30] sm:$0xff]  ;;  %v175_v18 = vld [vmem:[%s1177_s1 + $0x38] sm:$0xff] }
   0x7   :  { %830 = vmatmul.mubr.msk.f32.vlgmr.msra.gmra.mxu0 %vm38_vm0, %v31_v5  ;;  %855 = vmatprep.subr.mxu0 %v904_v9  ;;  %v1051_v40 = vld [vmem:[%s1179_s2] sm:$0xff] }
   0x8   :  { %839 = vmatmul.mubr.msk.f32.gmra.mxu1 %vm38_vm0, %v37_v6  ;;  %856 = vmatpush3.msra.mxu0 %v29_v0 }
   0x9   :  { %843 = vmatprep.mubr.msk.f32.mxu1 %vm38_vm0, %v168_v7  ;;  %832 = vmatprep.mubr.msk.f32.mxu0 %vm38_vm0, %v32_v8 }
   0xa   :  { %860 = vmatprep.subr.mxu1 %v904_v9  ;;  %879 = vmatprep.subr.mxu0 %v904_v9 }
   0xb   :  { %833 = vmatmul.mubr.msk.f32.gmra.mxu0 %vm38_vm0, %v33_v10 }
   0xc   :  { %844 = vmatmul.mubr.msk.f32.vlgmr.msra.gmra.mxu1 %vm38_vm0, %v169_v11  ;;  %857 = vmatprep.mubr.msk.f32.mxu0 %vm905_vm1, %v904_v9 }
   0xd   :  { %846 = vmatprep.mubr.msk.f32.mxu1 %vm38_vm0, %v170_v12 }
   0xf   :  { %858 = vmatmul.mubr.msk.f32.vlgmr.msra.gmra.mxu0 %vm38_vm0, %v305_v13 }
  0x10   :  { %847 = vmatmul.mubr.msk.f32.gmra.mxu1 %vm38_vm0, %v171_v14  ;;  %895 = vmatprep.mubr.msk.f32.mxu0 %vm905_vm1, %v904_v9 }
  0x11   :  { %849 = vmatprep.mubr.msk.f32.mxu1 %vm38_vm0, %v172_v15 }
  0x14   :  { %850 = vmatmul.mubr.msk.f32.gmra.mxu1 %vm38_vm0, %v173_v16 }
  0x15   :  { %852 = vmatprep.mubr.msk.f32.mxu1 %vm38_vm0, %v174_v17 }
  0x18   :  { %853 = vmatmul.mubr.msk.f32.gmra.mxu1 %vm38_vm0, %v175_v18 }
  0x19   :  { %876 = vmatprep.mubr.msk.f32.mxu1 %vm905_vm1, %v904_v9 }
  0xc4   :  { %v1031_v19 = vpop.f32.mrf.mxu1 }
  0xc6   :  { %v1033_v20 = vpop.f32.mrf.mxu1 }
  0xc7   :  { %v831_v21 = vpop.f32.mrf.mxu0 }
  0xc8   :  { %v1035_v22 = vpop.f32.mrf.mxu1 }
  0xc9   :  { %v129_v23 = vpop.f32.mrf.mxu0 }
  0xca   :  { %v1037_v24 = vpop.f32.mrf.mxu1 }
  0xcb   :  { %v1039_v25 = vpop.f32.mrf.mxu0 }
  0xcc   :  { %v845_v26 = vpop.f32.mrf.mxu1 }
  0xcd   :  { %v1041_v27 = vpop.f32.mrf.mxu0 }
  0xce   :  { %v266_v28 = vpop.f32.mrf.mxu1 }
  0xcf   :  { %v380_v29 = vmul.f32 0.0, %v266_v28  ;;  %v1043_v30 = vpop.f32.mrf.mxu0 }
  0xd0   :  { %v1061_v62 = vpop.f32.mrf.mxu1 }
  0xd1   :  { %v382_v31 = vsel %vm381_vm2, %v380_v29, 0.0  ;;  %v859_v32 = vpop.f32.mrf.mxu0 }
  0xd2   :  { %v383_v33 = vrot.slane %v382_v31, 4  ;;  %v276_v2 = vpop.f32.mrf.mxu1  ;;  %v441_v32 = vsub.s32 2, %v1046_v39 }
  0xd4   :  { %v384_v34 = vadd.f32 %v383_v33, %v382_v31 }
  0xd6   :  { %v385_v35 = vrot.slane %v384_v34, 2 }
  0xd8   :  { %v386_v37 = vadd.f32 %v385_v35, %v384_v34 }
  0xda   :  { %v387_v38 = vrot.slane %v386_v37, 1 }
  0xdc   :  { %v388_v41 = vadd.f32 %v387_v38, %v386_v37 }
  0xde   :  { %v389_v42 = vsub.f32 %v1051_v40, %v388_v41 }
  0xe0   :  { %v390_v44 = vmul.f32 %v389_v42, %v1043_v30 }
  0xe2   :  { %v394_v45 = vrot.slane %v390_v44, %v393_v43 }
  0xe4   :  { %v395_v46 = vmul.f32 %v394_v45, %v266_v28 }
  0xe6   :  { %v397_v47 = vmul.f32 %v395_v46, %v129_v23  ;;  %v405_v48 = vmul.f32 %v845_v26, %v395_v46 }
  0xe8   :  { %v406_v49 = vsel %vm381_vm2, %v405_v48, 0.0  ;;  %v398_v56 = vsel %vm381_vm2, %v397_v47, 0.0 }
  0xe9   :  { %v407_v50 = vrot.slane %v406_v49, 4  ;;  %v399_v60 = vrot.slane %v398_v56, 4 }
  0xeb   :  { %v408_v51 = vadd.f32 %v407_v50, %v406_v49  ;;  %v400_v0 = vadd.f32 %v399_v60, %v398_v56 }
  0xed   :  { %v409_v52 = vrot.slane %v408_v51, 2  ;;  %v401_v5 = vrot.slane %v400_v0, 2 }
  0xef   :  { %v410_v53 = vadd.f32 %v409_v52, %v408_v51  ;;  %v402_v11 = vadd.f32 %v401_v5, %v400_v0  ;;  %v595_v51 = vld [vmem:[%s1180_s5 + $0x28] sm:$0xff]  ;;  %v851_v5 = vpop.f32.mrf.mxu1 }
  0xf1   :  { %v411_v54 = vrot.slane %v410_v53, 1  ;;  %v403_v16 = vrot.slane %v402_v11, 1 }
  0xf3   :  { %v412_v55 = vadd.f32 %v411_v54, %v410_v53  ;;  %v594_v54 = vld [vmem:[%s1180_s5 + $0x20] sm:$0xff] }
  0xf5   :  { %v413_v57 = vsub.f32 %v1051_v40, %v412_v55  ;;  %v593_v55 = vld [vmem:[%s1180_s5 + $0x18] sm:$0xff] }
  0xf7   :  { %v414_v59 = vmul.f32 %v413_v57, %v1043_v30 }
  0xf9   :  { %v418_v61 = vrot.slane %v414_v59, %v417_v58  ;;  %v592_v58 = vld [vmem:[%s1180_s5 + $0x10] sm:$0xff] }
  0xfb   :  { %v419_v63 = vmul.f32 %v845_v26, %v418_v61  ;;  %v591_v61 = vld [vmem:[%s1180_s5 + $0x8] sm:$0xff] }
  0xfd   :  { %v420_v1 = vadd.f32 %v419_v63, %v395_v46  ;;  %v597_v46 = vld [vmem:[%s1180_s5 + $0x38] sm:$0xff] }
  0xfe   :  { %861 = vmatpush3.msra.mxu1 %v597_v46 }
  0xff   :  { %v421_v3 = vmul.f32 %v831_v21, %v420_v1  ;;  %v429_v4 = vmul.f32 %v420_v1, %v276_v2  ;;  %v404_v21 = vadd.f32 %v403_v16, %v402_v11  ;;  %862 = vmatprep.subr.mxu1 %v904_v9 }
 0x101   :  { %v422_v6 = vsel %vm381_vm2, %v421_v3, 0.0  ;;  %v430_v7 = vsel %vm381_vm2, %v429_v4, 0.0 }
 0x102   :  { %v423_v8 = vrot.slane %v422_v6, 4  ;;  %v431_v10 = vrot.slane %v430_v7, 4 }
 0x104   :  { %v424_v12 = vadd.f32 %v423_v8, %v422_v6  ;;  %v432_v13 = vadd.f32 %v431_v10, %v430_v7  ;;  %v286_v8 = vpop.f32.mrf.mxu1 }
 0x106   :  { %v425_v14 = vrot.slane %v424_v12, 2  ;;  %v433_v15 = vrot.slane %v432_v13, 2 }
 0x108   :  { %v426_v17 = vadd.f32 %v425_v14, %v424_v12  ;;  %v434_v18 = vadd.f32 %v433_v15, %v432_v13 }
 0x10a   :  { %v427_v23 = vrot.slane %v426_v17, 1  ;;  %v435_v26 = vrot.slane %v434_v18, 1 }
 0x10c   :  { %v428_v28 = vadd.f32 %v427_v23, %v426_v17  ;;  %v436_v29 = vadd.f32 %v435_v26, %v434_v18 }
 0x10e   :  { %v437_v31 = vsub.f32 %v1051_v40, %v436_v29  ;;  %v574_v33 = vsel %vm573_vm3, %v404_v21, %v428_v28 }
 0x110   :  { %v438_v34 = vmul.f32 %v437_v31, %v1043_v30 }
 0x112   :  { %v442_v35 = vrot.slane %v438_v34, %v441_v32  ;;  %v489_v32 = vsub.s32 4, %v1046_v39 }
 0x114   :  { %v443_v36 = vmul.f32 %v442_v35, %v276_v2  ;;  %v590_v2 = vld [vmem:[%s1180_s5] sm:$0xff] }
 0x116   :  { %v444_v37 = vadd.f32 %v443_v36, %v420_v1  ;;  %v465_v1 = vsub.s32 3, %v1046_v39 }
 0x118   :  { %v445_v38 = vmul.f32 %v444_v37, %v1041_v27  ;;  %v453_v41 = vmul.f32 %v1061_v62, %v444_v37  ;;  %v596_v27 = vld [vmem:[%s1180_s5 + $0x30] sm:$0xff] }
 0x119   :  { %863 = vmatpush3.msra.mxu1 %v596_v27 }
 0x11a   :  { %v446_v42 = vsel %vm381_vm2, %v445_v38, 0.0  ;;  %v454_v43 = vsel %vm381_vm2, %v453_v41, 0.0  ;;  %864 = vmatprep.subr.mxu1 %v904_v9 }
 0x11b   :  { %v447_v44 = vrot.slane %v446_v42, 4  ;;  %v455_v45 = vrot.slane %v454_v43, 4  ;;  %865 = vmatpush3.msra.mxu1 %v595_v51 }
 0x11c   :  { %866 = vmatprep.subr.mxu1 %v904_v9 }
 0x11d   :  { %v448_v47 = vadd.f32 %v447_v44, %v446_v42  ;;  %v456_v48 = vadd.f32 %v455_v45, %v454_v43  ;;  %867 = vmatpush3.msra.mxu1 %v594_v54 }
 0x11e   :  { %868 = vmatprep.subr.mxu1 %v904_v9 }
 0x11f   :  { %v449_v49 = vrot.slane %v448_v47, 2  ;;  %v457_v50 = vrot.slane %v456_v48, 2  ;;  %869 = vmatpush3.msra.mxu1 %v593_v55 }
 0x120   :  { %870 = vmatprep.subr.mxu1 %v904_v9 }
 0x121   :  { %v450_v52 = vadd.f32 %v449_v49, %v448_v47  ;;  %v458_v53 = vadd.f32 %v457_v50, %v456_v48  ;;  %871 = vmatpush3.msra.mxu1 %v592_v58 }
 0x122   :  { %872 = vmatprep.subr.mxu1 %v904_v9 }
 0x123   :  { %v451_v56 = vrot.slane %v450_v52, 1  ;;  %v459_v57 = vrot.slane %v458_v53, 1  ;;  %873 = vmatpush3.msra.mxu1 %v591_v61 }
 0x124   :  { %874 = vmatprep.subr.mxu1 %v904_v9 }
 0x125   :  { %v452_v59 = vadd.f32 %v451_v56, %v450_v52  ;;  %v460_v60 = vadd.f32 %v459_v57, %v458_v53  ;;  %875 = vmatpush3.msra.mxu1 %v590_v2  ;;  %v513_v56 = vsub.s32 5, %v1046_v39 }
 0x127   :  { %v576_v63 = vsel %vm575_vm4, %v574_v33, %v452_v59  ;;  %v461_v0 = vsub.f32 %v1051_v40, %v460_v60  ;;  %v854_v59 = vpop.f32.mrf.mxu1 }
 0x129   :  { %v462_v3 = vmul.f32 %v461_v0, %v1043_v30 }
 0x12b   :  { %v466_v4 = vrot.slane %v462_v3, %v465_v1 }
 0x12d   :  { %v467_v6 = vmul.f32 %v1061_v62, %v466_v4 }
 0x12f   :  { %v468_v7 = vadd.f32 %v467_v6, %v444_v37 }
 0x131   :  { %v469_v10 = vmul.f32 %v1039_v25, %v468_v7  ;;  %v477_v11 = vmul.f32 %v468_v7, %v286_v8 }
 0x133   :  { %v470_v12 = vsel %vm381_vm2, %v469_v10, 0.0  ;;  %v478_v13 = vsel %vm381_vm2, %v477_v11, 0.0  ;;  %v537_v11 = vsub.s32 6, %v1046_v39 }
 0x134   :  { %v471_v14 = vrot.slane %v470_v12, 4  ;;  %v479_v15 = vrot.slane %v478_v13, 4 }
 0x136   :  { %v472_v16 = vadd.f32 %v471_v14, %v470_v12  ;;  %v480_v17 = vadd.f32 %v479_v15, %v478_v13 }
 0x138   :  { %v473_v18 = vrot.slane %v472_v16, 2  ;;  %v481_v23 = vrot.slane %v480_v17, 2 }
 0x13a   :  { %v474_v26 = vadd.f32 %v473_v18, %v472_v16  ;;  %v482_v21 = vadd.f32 %v481_v23, %v480_v17 }
 0x13c   :  { %v475_v28 = vrot.slane %v474_v26, 1  ;;  %v483_v29 = vrot.slane %v482_v21, 1 }
 0x13e   :  { %v476_v62 = vadd.f32 %v475_v28, %v474_v26  ;;  %v484_v31 = vadd.f32 %v483_v29, %v482_v21 }
 0x140   :  { %v485_v25 = vsub.f32 %v1051_v40, %v484_v31  ;;  %v578_v33 = vsel %vm577_vm5, %v576_v63, %v476_v62  ;;  %v296_v63 = vpop.f32.mrf.mxu1 }
 0x142   :  { %v486_v34 = vmul.f32 %v485_v25, %v1043_v30 }
 0x144   :  { %v490_v35 = vrot.slane %v486_v34, %v489_v32 }
 0x146   :  { %v491_v36 = vmul.f32 %v490_v35, %v286_v8  ;;  %v561_v35 = vsub.s32 7, %v1046_v39 }
 0x148   :  { %v492_v37 = vadd.f32 %v491_v36, %v468_v7 }
 0x14a   :  { %v493_v38 = vmul.f32 %v492_v37, %v1033_v20  ;;  %v501_v41 = vmul.f32 %v851_v5, %v492_v37 }
 0x14c   :  { %v494_v42 = vsel %vm381_vm2, %v493_v38, 0.0  ;;  %v502_v43 = vsel %vm381_vm2, %v501_v41, 0.0 }
 0x14d   :  { %v495_v44 = vrot.slane %v494_v42, 4  ;;  %v503_v45 = vrot.slane %v502_v43, 4 }
 0x14f   :  { %v496_v46 = vadd.f32 %v495_v44, %v494_v42  ;;  %v504_v47 = vadd.f32 %v503_v45, %v502_v43 }
 0x151   :  { %v497_v48 = vrot.slane %v496_v46, 2  ;;  %v505_v27 = vrot.slane %v504_v47, 2 }
 0x153   :  { %v498_v49 = vadd.f32 %v497_v48, %v496_v46  ;;  %v506_v50 = vadd.f32 %v505_v27, %v504_v47 }
 0x155   :  { %v499_v51 = vrot.slane %v498_v49, 1  ;;  %v507_v52 = vrot.slane %v506_v50, 1 }
 0x157   :  { %v500_v53 = vadd.f32 %v499_v51, %v498_v49  ;;  %v508_v54 = vadd.f32 %v507_v52, %v506_v50 }
 0x159   :  { %v1116_v55 = vsel %vm579_vm6, %v578_v33, %v500_v53  ;;  %v509_v20 = vsub.f32 %v1051_v40, %v508_v54 }
 0x15b   :  { %v510_v57 = vmul.f32 %v509_v20, %v1043_v30 }
 0x15d   :  { %v514_v58 = vrot.slane %v510_v57, %v513_v56 }
 0x15f   :  { %v515_v60 = vmul.f32 %v851_v5, %v514_v58 }
 0x161   :  { %v516_v61 = vadd.f32 %v515_v60, %v492_v37  ;;  %v689_v60 = vld [vmem:[%s1181_s7 + $0x30] sm:$0xff] }
 0x163   :  { %v525_v0 = vmul.f32 %v516_v61, %v296_v63  ;;  %v517_v23 = vmul.f32 %v1031_v19, %v516_v61 }
 0x165   :  { %v526_v1 = vsel %vm381_vm2, %v525_v0, 0.0  ;;  %v518_v29 = vsel %vm381_vm2, %v517_v23, 0.0  ;;  %v685_v0 = vld [vmem:[%s1181_s7 + $0x10] sm:$0xff] }
 0x166   :  { %v527_v2 = vrot.slane %v526_v1, 4  ;;  %v519_v32 = vrot.slane %v518_v29, 4 }
 0x168   :  { %v528_v3 = vadd.f32 %v527_v2, %v526_v1  ;;  %v520_v37 = vadd.f32 %v519_v32, %v518_v29  ;;  %v684_v1 = vld [vmem:[%s1181_s7 + $0x8] sm:$0xff]  ;;  %v683_v2 = vld [vmem:[%s1181_s7] sm:$0xff] }
 0x16a   :  { %v529_v4 = vrot.slane %v528_v3, 2 }
 0x16c   :  { %v530_v6 = vadd.f32 %v529_v4, %v528_v3 }
 0x16e   :  { %v531_v7 = vrot.slane %v530_v6, 1 }
 0x170   :  { %v532_v8 = vadd.f32 %v531_v7, %v530_v6 }
 0x172   :  { %v533_v10 = vsub.f32 %v1051_v40, %v532_v8 }
 0x174   :  { %v534_v12 = vmul.f32 %v533_v10, %v1043_v30  ;;  %v787_v10 = vld [vmem:[%s1182_s6] ss:$0 sm:$0xff] }
 0x176   :  { %v538_v13 = vrot.slane %v534_v12, %v537_v11 }
 0x178   :  { %v539_v14 = vmul.f32 %v538_v13, %v296_v63  ;;  %v686_v63 = vld [vmem:[%s1181_s7 + $0x18] sm:$0xff] }
 0x17a   :  { %v540_v5 = vadd.f32 %v539_v14, %v516_v61  ;;  %v687_v61 = vld [vmem:[%s1181_s7 + $0x20] sm:$0xff] }
 0x17c   :  { %v549_v15 = vmul.f32 %v854_v59, %v540_v5  ;;  %v541_v21 = vmul.f32 %v540_v5, %v1037_v24  ;;  %v521_v24 = vrot.slane %v520_v37, 2 }
 0x17e   :  { %v550_v16 = vsel %vm381_vm2, %v549_v15, 0.0  ;;  %v542_v31 = vsel %vm381_vm2, %v541_v21, 0.0  ;;  %v522_v45 = vadd.f32 %v521_v24, %v520_v37 }
 0x17f   :  { %v551_v17 = vrot.slane %v550_v16, 4  ;;  %v543_v33 = vrot.slane %v542_v31, 4 }
 0x180   :  { %v523_v27 = vrot.slane %v522_v45, 1 }
 0x181   :  { %v552_v18 = vadd.f32 %v551_v17, %v550_v16  ;;  %v544_v19 = vadd.f32 %v543_v33, %v542_v31 }
 0x182   :  { %v524_v50 = vadd.f32 %v523_v27, %v522_v45 }
 0x183   :  { %v553_v26 = vrot.slane %v552_v18, 2  ;;  %v545_v42 = vrot.slane %v544_v19, 2 }
 0x184   :  { %v582_v54 = vsel %vm581_vm7, %v1116_v55, %v524_v50  ;;  %v688_v55 = vld [vmem:[%s1181_s7 + $0x28] sm:$0xff] }
 0x185   :  { %v554_v28 = vadd.f32 %v553_v26, %v552_v18  ;;  %v546_v46 = vadd.f32 %v545_v42, %v544_v19 }
 0x187   :  { %v555_v62 = vrot.slane %v554_v28, 1  ;;  %v547_v49 = vrot.slane %v546_v46, 1 }
 0x189   :  { %v556_v25 = vadd.f32 %v555_v62, %v554_v28  ;;  %v548_v51 = vadd.f32 %v547_v49, %v546_v46 }
 0x18b   :  { %v557_v34 = vsub.f32 %v1051_v40, %v556_v25 }
 0x18d   :  { %v558_v36 = vmul.f32 %v557_v34, %v1043_v30 }
 0x18f   :  { %v562_v38 = vrot.slane %v558_v36, %v561_v35 }
 0x191   :  { %v563_v41 = vmul.f32 %v854_v59, %v562_v38  ;;  %v690_v59 = vld [vmem:[%s1181_s7 + $0x38] sm:$0xff] }
 0x192   :  { %880 = vmatpush3.msra.mxu0 %v690_v59 }
 0x193   :  { %v564_v43 = vadd.f32 %v563_v41, %v540_v5  ;;  %881 = vmatprep.subr.mxu0 %v904_v9 }
 0x194   :  { %882 = vmatpush3.msra.mxu0 %v689_v60 }
 0x195   :  { %v565_v44 = vmul.f32 %v1035_v22, %v564_v43  ;;  %v584_v22 = vsel %vm583_vm8, %v582_v54, %v548_v51  ;;  %883 = vmatprep.subr.mxu0 %v904_v9 }
 0x196   :  { %884 = vmatpush3.msra.mxu0 %v688_v55 }
 0x197   :  { %v566_v47 = vsel %vm381_vm2, %v565_v44, 0.0  ;;  %885 = vmatprep.subr.mxu0 %v904_v9 }
 0x198   :  { %v567_v48 = vrot.slane %v566_v47, 4  ;;  %886 = vmatpush3.msra.mxu0 %v687_v61 }
 0x199   :  { %887 = vmatprep.subr.mxu0 %v904_v9 }
 0x19a   :  { %v568_v40 = vadd.f32 %v567_v48, %v566_v47  ;;  %888 = vmatpush3.msra.mxu0 %v686_v63 }
 0x19b   :  { %889 = vmatprep.subr.mxu0 %v904_v9 }
 0x19c   :  { %v569_v39 = vrot.slane %v568_v40, 2  ;;  %890 = vmatpush3.msra.mxu0 %v685_v0 }
 0x19d   :  { %891 = vmatprep.subr.mxu0 %v904_v9 }
 0x19e   :  { %v570_v30 = vadd.f32 %v569_v39, %v568_v40  ;;  %892 = vmatpush3.msra.mxu0 %v684_v1 }
 0x19f   :  { %893 = vmatprep.subr.mxu0 %v904_v9 }
 0x1a0   :  { %v571_v52 = vrot.slane %v570_v30, 1  ;;  %894 = vmatpush3.msra.mxu0 %v683_v2 }
 0x1a2   :  { %v572_v53 = vadd.f32 %v571_v52, %v570_v30 }
 0x1a4   :  { %v586_v20 = vsel %vm585_vm9, %v584_v22, %v572_v53 }
 0x1a5   :  { %v587_v56 = vpack.c.bf16 %v586_v20, %v586_v20 }
 0x1a7   :  { %v588_v57 = vunpack.c.l.bf16 %v587_v56 }
 0x1a9   :  { %v589_v58 = vmul.f32 %v588_v57, %v588_v57 }
 0x1ab   :  { %877 = vmatmul.mubr.msk.f32.vlgmr.msra.gmra.mxu1 %vm381_vm2, %v589_v58 }
 0x26b   :  { %v667_v3 = vpop.f32.mrf.mxu1 }
 0x26c   :  { %v671_v4 = vmul.f32 0.125, %v667_v3 }
 0x26d   :  { %v878_v6 = vpop.f32.mrf.mxu1 }
 0x26e   :  { %v672_v7 = vadd.f32 1e-05, %v671_v4 }
 0x270   :  { %902 = vrsqrt.f32 %v672_v7 }
 0x27d   :  { %v903_v8 = vpop.eup %902 }
 0x27e   :  { %v674_v11 = vmul.f32 %v903_v8, %v588_v57 }
 0x280   :  { %v682_v12 = vmul.f32 %v787_v10, %v674_v11 }
 0x282   :  { %896 = vmatmul.mubr.msk.f32.vlgmr.msra.gmra.mxu0 %vm381_vm2, %v682_v12 }
 0x342   :  { %v760_v13 = vpop.f32.mrf.mxu0 }
 0x343   :  { %764 = vst [vmem:[%s1183_s8] sm:$0xff] %v760_v13 }
 0x344   :  { %v897_v9 = vpop.f32.mrf.mxu0 }

</bundles_post_ra>
